<compile_context>
chip_gen: v6e
topology: v6e:2x2x1
jax: 0.10.0
libtpu: 0.0.40
codegen_flags: <defaults>
</compile_context>

<pallas_src>
import jax
import jax.numpy as jnp
import numpy as np
from jax.experimental import pallas as pl
from jax.experimental.pallas import tpu as pltpu


def fused_decoder_kernel(
    ids_ref,                                   # SMEM (T, Bp) int32  (scalar prefetch)
    h0_ref, enc_ref,                           # (Bp,Hp) f32, (Bp,L,Hp) bf16   [resident]
    wi_ref, wh_ref, wc_ref, wo_ref,            # packed bf16 weights           [resident]
    b_ref, bo_ref,                             # (3,3Hp) f32, (1,Vp) f32       [resident]
    emb_hbm,                                   # (V, Hp) f32 embedding table in HBM
    probs_ref, hfin_ref,                       # out: (1,Bp,Vp) f32 per step, (Bp,Hp) f32 final
    h_scr, emb_buf, emb_sem,                   # scratch: carried hidden, emb double-buffer, sems
):
    f32, bf16 = jnp.float32, jnp.bfloat16
    t = pl.program_id(0)
    num_t = pl.num_programs(0)
    Bp, Hp = h0_ref.shape

    # ---- embedding row gather: DMA B rows from HBM, double-buffered across steps ----
    def start_fetch(step, slot):
        for b in range(Bp):
            pltpu.make_async_copy(
                emb_hbm.at[pl.ds(ids_ref[step, b], 1), :],
                emb_buf.at[slot, pl.ds(b, 1), :],
                emb_sem.at[slot, b],
            ).start()

    @pl.when(t == 0)
    def _():
        h_scr[...] = h0_ref[...]
        start_fetch(0, 0)

    slot = t % 2
    for b in range(Bp):                        # wait for this step's embedding rows
        pltpu.make_async_copy(
            emb_hbm.at[pl.ds(0, 1), :],
            emb_buf.at[slot, pl.ds(b, 1), :],
            emb_sem.at[slot, b],
        ).wait()

    @pl.when(t + 1 < num_t)                    # prefetch next step's rows under this compute
    def _():
        start_fetch(t + 1, 1 - slot)

    x = emb_buf[slot]                          # (Bp, Hp) f32; dropout == identity (eval mode)
    h = h_scr[...]                             # (Bp, Hp) f32

    # ---- GRU cell: gates fused into two MXU matmuls; gate g lives in lanes [g*Hp, (g+1)*Hp) ----
    # Bias folding (done in prepare_params): b_ref[0] = [b_ir+b_hr | b_iz+b_hz | b_in],
    #                                        b_ref[1] = [0 | 0 | b_hn].
    gi = jnp.dot(x.astype(bf16), wi_ref[...], preferred_element_type=f32) + b_ref[0:1, :]
    gh = jnp.dot(h.astype(bf16), wh_ref[...], preferred_element_type=f32) + b_ref[1:2, :]
    r = jax.nn.sigmoid(gi[:, 0:Hp] + gh[:, 0:Hp])
    z = jax.nn.sigmoid(gi[:, Hp:2 * Hp] + gh[:, Hp:2 * Hp])
    n = jnp.tanh(gi[:, 2 * Hp:3 * Hp] + r * gh[:, 2 * Hp:3 * Hp])
    h_new = (1.0 - z) * n + z * h                                    # (Bp, Hp)

    # ---- dot attention over L + exact f32 softmax (padded batch rows / lanes are all-zero) ----
    enc = enc_ref[...].astype(f32)                                   # (Bp, L, Hp)
    scores = jnp.sum(h_new[:, None, :] * enc, axis=2)                # (Bp, L)
    m = jnp.max(scores, axis=1, keepdims=True)
    e = jnp.exp(scores - m)
    attn = e / jnp.sum(e, axis=1, keepdims=True)                     # (Bp, L)
    context = jnp.sum(attn[:, :, None] * enc, axis=1)                # (Bp, Hp)

    # ---- concat Linear + tanh: one packed (2Hp, Hp) weight, two static sublane slices ----
    cat_out = jnp.tanh(
        jnp.dot(h_new.astype(bf16), wc_ref[0:Hp, :], preferred_element_type=f32)
        + jnp.dot(context.astype(bf16), wc_ref[Hp:2 * Hp, :], preferred_element_type=f32)
        + b_ref[2:3, 0:Hp]
    )                                                                # (Bp, Hp)

    # ---- output projection + softmax over the padded vocab (padded lanes carry -1e30 bias) ----
    logits = jnp.dot(cat_out.astype(bf16), wo_ref[...], preferred_element_type=f32) + bo_ref[...]
    lm = jnp.max(logits, axis=1, keepdims=True)
    le = jnp.exp(logits - lm)
    probs = le / jnp.sum(le, axis=1, keepdims=True)                  # (Bp, Vp)

    probs_ref[0] = probs
    h_scr[...] = h_new
    hfin_ref[...] = h_new


def prepare_params(params, Hp=128, Vp=128):
    """One-time packing / padding / bf16 cast, hoisted out of the decode path.

    H is padded to Hp (each GRU gate gets its own Hp-lane block), V to Vp; all padded weight /
    bias entries are zero except the output bias, whose padded lanes are -1e30 (softmax mask).
    """
    f32, bf16 = jnp.float32, jnp.bfloat16
    H = params["w_hh"].shape[1]
    V = params["w_out"].shape[0]

    def pack_gates(w):                          # (3H, H) rows [r; z; n] -> (Hp, 3*Hp)
        out = jnp.zeros((Hp, 3 * Hp), f32)
        for g in range(3):
            out = out.at[:H, g * Hp:g * Hp + H].set(w[g * H:(g + 1) * H, :].T)
        return out.astype(bf16)

    def pack_gate_bias(b):                      # (3H,) -> (3*Hp,)
        out = jnp.zeros((3 * Hp,), f32)
        for g in range(3):
            out = out.at[g * Hp:g * Hp + H].set(b[g * H:(g + 1) * H])
        return out

    b_ih = params["b_ih"].astype(f32)
    b_hh = params["b_hh"].astype(f32)
    # Fold r/z biases onto the input side; keep b_hn on the hidden side (it sits inside r*(...)).
    b_gi = pack_gate_bias(jnp.concatenate([b_ih[:2 * H] + b_hh[:2 * H], b_ih[2 * H:]]))
    b_gh = pack_gate_bias(jnp.concatenate([jnp.zeros((2 * H,), f32), b_hh[2 * H:]]))
    b_cat = jnp.zeros((3 * Hp,), f32).at[:H].set(params["b_cat"].astype(f32))

    w_cat = params["w_cat"].astype(f32)         # (H, 2H)
    wc = jnp.zeros((2 * Hp, Hp), f32)
    wc = wc.at[:H, :H].set(w_cat[:, :H].T)      # rnn_output half
    wc = wc.at[Hp:Hp + H, :H].set(w_cat[:, H:].T)   # context half

    wo = jnp.zeros((Hp, Vp), f32).at[:H, :V].set(params["w_out"].astype(f32).T)
    bo = jnp.full((1, Vp), -1e30, f32).at[0, :V].set(params["b_out"].astype(f32))

    emb = jnp.zeros((V, Hp), f32).at[:, :H].set(params["embedding"].astype(f32))

    return {
        "H": H, "V": V, "Hp": Hp, "Vp": Vp,
        "embedding": emb,                                 # (V, Hp) f32 — stays in HBM
        "w_i": pack_gates(params["w_ih"].astype(f32)),    # (Hp, 3Hp) bf16
        "w_h": pack_gates(params["w_hh"].astype(f32)),    # (Hp, 3Hp) bf16
        "w_c": wc.astype(bf16),                           # (2Hp, Hp) bf16
        "w_o": wo.astype(bf16),                           # (Hp, Vp)  bf16
        "b_packed": jnp.stack([b_gi, b_gh, b_cat], 0),    # (3, 3Hp)  f32
        "b_o": bo,                                        # (1, Vp)   f32
    }


def luong_attn_decode(input_steps, last_hidden, encoder_outputs, packed):
    """Fused teacher-forced decode: one pallas_call for all T steps.

    input_steps (T, B) int32; last_hidden (1, B, H); encoder_outputs (L, B, H).
    Returns (probs (T, B, V), final hidden (1, B, H)).
    """
    T, B = input_steps.shape
    L = encoder_outputs.shape[0]
    H, V, Hp, Vp = packed["H"], packed["V"], packed["Hp"], packed["Vp"]
    Bp = max(8, ((B + 7) // 8) * 8)

    # Pad / lay out activations once per decode (lane-dense, zero padding).
    ids = jnp.zeros((T, Bp), jnp.int32).at[:, :B].set(input_steps)
    h0 = jnp.zeros((Bp, Hp), jnp.float32).at[:B, :H].set(last_hidden[0])
    enc = (jnp.zeros((Bp, L, Hp), jnp.float32)
           .at[:B, :, :H].set(jnp.transpose(encoder_outputs, (1, 0, 2)))
           .astype(jnp.bfloat16))

    # Advisory cost estimate for the XLA scheduler.
    flops = T * 2 * Bp * (2 * Hp * 3 * Hp + 2 * Hp * Hp + Hp * Vp + 2 * L * Hp)
    trans = T * Bp * (3 * Hp + Hp + L + Vp)
    weight_bytes = 2 * (2 * Hp * 3 * Hp + 2 * Hp * Hp + Hp * Vp)
    bytes_accessed = weight_bytes + enc.size * 2 + T * Bp * (Vp + 2 * Hp) * 4

    grid_spec = pltpu.PrefetchScalarGridSpec(
        num_scalar_prefetch=1,                                      # token ids -> SMEM
        grid=(T,),
        in_specs=[
            pl.BlockSpec((Bp, Hp), lambda t, ids: (0, 0)),          # initial hidden
            pl.BlockSpec((Bp, L, Hp), lambda t, ids: (0, 0, 0)),    # encoder outputs (resident)
            pl.BlockSpec((Hp, 3 * Hp), lambda t, ids: (0, 0)),      # w_i (resident)
            pl.BlockSpec((Hp, 3 * Hp), lambda t, ids: (0, 0)),      # w_h (resident)
            pl.BlockSpec((2 * Hp, Hp), lambda t, ids: (0, 0)),      # w_c (resident)
            pl.BlockSpec((Hp, Vp), lambda t, ids: (0, 0)),          # w_o (resident)
            pl.BlockSpec((3, 3 * Hp), lambda t, ids: (0, 0)),       # packed GRU/concat biases
            pl.BlockSpec((1, Vp), lambda t, ids: (0, 0)),           # output bias (+ vocab mask)
            pl.BlockSpec(memory_space=pl.ANY),                      # embedding table in HBM
        ],
        out_specs=(
            pl.BlockSpec((1, Bp, Vp), lambda t, ids: (t, 0, 0)),    # per-step probs (lane-dense)
            pl.BlockSpec((Bp, Hp), lambda t, ids: (0, 0)),          # final hidden (resident)
        ),
        scratch_shapes=[
            pltpu.VMEM((Bp, Hp), jnp.float32),                      # carried hidden state
            pltpu.VMEM((2, Bp, Hp), jnp.float32),                   # double-buffered emb rows
            pltpu.SemaphoreType.DMA((2, Bp)),                       # per-row DMA semaphores
        ],
    )

    probs_p, h_p = pl.pallas_call(
        fused_decoder_kernel,
        grid_spec=grid_spec,
        out_shape=(
            jax.ShapeDtypeStruct((T, Bp, Vp), jnp.float32),
            jax.ShapeDtypeStruct((Bp, Hp), jnp.float32),
        ),
        compiler_params=pltpu.CompilerParams(
            dimension_semantics=("arbitrary",),        # serial recurrence over decode steps
            vmem_limit_bytes=32 * 1024 * 1024,         # > v5e 16 MiB default, <= v7x 64 MiB
        ),
        cost_estimate=pl.CostEstimate(flops=flops, transcendentals=trans,
                                      bytes_accessed=bytes_accessed),
    )(ids, h0, enc,
      packed["w_i"], packed["w_h"], packed["w_c"], packed["w_o"],
      packed["b_packed"], packed["b_o"], packed["embedding"])

    return probs_p[:, :B, :V], h_p[None, :B, :H]


def luong_attn_decoder_forward(input_step, last_hidden, encoder_outputs, packed):
    """Module-equivalent single step (T == 1 case of the fused kernel).

    input_step (1,B) int32; last_hidden (1,B,H); encoder_outputs (L,B,H).
    Returns (probs (B,V), hidden (1,B,H)).
    """
    probs, hidden = luong_attn_decode(input_step, last_hidden, encoder_outputs, packed)
    return probs[0], hidden


def reference_forward(input_step, last_hidden, encoder_outputs, params):
    """Pure-JAX f32 reference reproducing the PyTorch forward (eval mode)."""
    H = last_hidden.shape[2]
    emb = jnp.take(params["embedding"], input_step[0], axis=0)           # (B, H)
    h = last_hidden[0]
    w_ih, w_hh, b_ih, b_hh = params["w_ih"], params["w_hh"], params["b_ih"], params["b_hh"]

    gi = emb @ w_ih.T + b_ih
    gh = h @ w_hh.T + b_hh
    r = jax.nn.sigmoid(gi[:, :H] + gh[:, :H])
    z = jax.nn.sigmoid(gi[:, H:2 * H] + gh[:, H:2 * H])
    n = jnp.tanh(gi[:, 2 * H:] + r * gh[:, 2 * H:])
    h_new = (1.0 - z) * n + z * h

    scores = jnp.sum(h_new[None] * encoder_outputs, axis=2).T            # (B, L)
    attn = jax.nn.softmax(scores, axis=1)                                # (B, L)
    context = jnp.einsum("bl,lbh->bh", attn, encoder_outputs)

    cat_in = jnp.concatenate([h_new, context], axis=1)
    cat_out = jnp.tanh(cat_in @ params["w_cat"].T + params["b_cat"])
    logits = cat_out @ params["w_out"].T + params["b_out"]
    return jax.nn.softmax(logits, axis=1), h_new[None]


def reference_decode(input_steps, last_hidden, encoder_outputs, params):
    """Reference teacher-forced decode loop (one reference_forward per step)."""
    hidden = last_hidden
    probs_all = []
    for t in range(input_steps.shape[0]):
        p, hidden = reference_forward(input_steps[t:t + 1], hidden, encoder_outputs, params)
        probs_all.append(p)
    return jnp.stack(probs_all, 0), hidden


if __name__ == "__main__":
    B, H, L, V, T = 2, 32, 8, 64, 4   # batch, hidden_size, encoder seq len, vocab size, steps

    key = jax.random.PRNGKey(0)
    keys = jax.random.split(key, 13)
    params = {
        "embedding": 0.1 * jax.random.normal(keys[0], (V, H), jnp.float32),
        "w_ih": 0.1 * jax.random.normal(keys[1], (3 * H, H), jnp.float32),
        "w_hh": 0.1 * jax.random.normal(keys[2], (3 * H, H), jnp.float32),
        "b_ih": 0.1 * jax.random.normal(keys[3], (3 * H,), jnp.float32),
        "b_hh": 0.1 * jax.random.normal(keys[4], (3 * H,), jnp.float32),
        "w_cat": 0.1 * jax.random.normal(keys[5], (H, 2 * H), jnp.float32),
        "b_cat": 0.1 * jax.random.normal(keys[6], (H,), jnp.float32),
        "w_out": 0.1 * jax.random.normal(keys[7], (V, H), jnp.float32),
        "b_out": 0.1 * jax.random.normal(keys[8], (V,), jnp.float32),
    }

    input_step = jax.random.randint(keys[9], (1, B), 0, V, jnp.int32)
    last_hidden = 0.1 * jax.random.normal(keys[10], (1, B, H), jnp.float32)
    encoder_outputs = 0.1 * jax.random.normal(keys[11], (L, B, H), jnp.float32)
    tokens = jax.random.randint(keys[12], (T, B), 0, V, jnp.int32)

    # One-time parameter packing (hoisted out of the decode path).
    packed = prepare_params(params)

    # --- single decode step (the module's forward()) ---
    probs, hidden = luong_attn_decoder_forward(input_step, last_hidden, encoder_outputs, packed)
    jax.block_until_ready((probs, hidden))

    probs_ref, hidden_ref = reference_forward(input_step, last_hidden, encoder_outputs, params)
    np.testing.assert_allclose(np.asarray(probs), np.asarray(probs_ref), rtol=2e-3, atol=2e-3)
    np.testing.assert_allclose(np.asarray(hidden), np.asarray(hidden_ref), rtol=2e-3, atol=2e-3)
    assert probs.shape == (B, V) and hidden.shape == (1, B, H)
    np.testing.assert_allclose(np.asarray(probs).sum(axis=1), np.ones(B), rtol=1e-4, atol=1e-4)

    # --- fused multi-step (teacher-forced) decode: one pallas_call for all T steps ---
    probs_seq, hidden_seq = luong_attn_decode(tokens, last_hidden, encoder_outputs, packed)
    jax.block_until_ready((probs_seq, hidden_seq))

    probs_seq_ref, hidden_seq_ref = reference_decode(tokens, last_hidden, encoder_outputs, params)
    np.testing.assert_allclose(np.asarray(probs_seq), np.asarray(probs_seq_ref),
                               rtol=2e-3, atol=2e-3)
    np.testing.assert_allclose(np.asarray(hidden_seq), np.asarray(hidden_seq_ref),
                               rtol=2e-3, atol=2e-3)
    assert probs_seq.shape == (T, B, V) and hidden_seq.shape == (1, B, H)

    print("KERNEL_OK")
</pallas_src>

<mosaic_0001>
module attributes {stable_mosaic.version = 11 : i64} {
  func.func @fused_decoder_kernel(%arg0: i32, %arg1: memref<1x8xi32, #tpu.memory_space<smem>>, %arg2: memref<8x128xf32, #tpu.memory_space<vmem>>, %arg3: memref<8x8x128xbf16, #tpu.memory_space<vmem>>, %arg4: memref<128x384xbf16, #tpu.memory_space<vmem>>, %arg5: memref<128x384xbf16, #tpu.memory_space<vmem>>, %arg6: memref<256x128xbf16, #tpu.memory_space<vmem>>, %arg7: memref<128x128xbf16, #tpu.memory_space<vmem>>, %arg8: memref<3x384xf32, #tpu.memory_space<vmem>>, %arg9: memref<1x128xf32, #tpu.memory_space<vmem>>, %arg10: memref<64x128xf32, #tpu.memory_space<any>>, %arg11: memref<1x8x128xf32, #tpu.memory_space<vmem>>, %arg12: memref<8x128xf32, #tpu.memory_space<vmem>>, %arg13: memref<8x128xf32, #tpu.memory_space<vmem>>, %arg14: memref<2x8x128xf32, #tpu.memory_space<vmem>>, %arg15: memref<2x8x!tpu.dma_semaphore, #tpu.memory_space<semaphore_mem>>) attributes {dimension_semantics = [#tpu.dimension_semantics<arbitrary>], iteration_bounds = array<i64: 1>, scalar_prefetch = 1 : i64, scratch_operands = 3 : i64, tpu.core_type = #tpu.core_type<tc>, window_params = [{pipeline_mode = #tpu.pipeline_mode<synchronous>, transform_indices = @transform_0, window_bounds = array<i64: 8, 128>}, {pipeline_mode = #tpu.pipeline_mode<synchronous>, transform_indices = @transform_1, window_bounds = array<i64: 8, 8, 128>}, {pipeline_mode = #tpu.pipeline_mode<synchronous>, transform_indices = @transform_2, window_bounds = array<i64: 128, 384>}, {pipeline_mode = #tpu.pipeline_mode<synchronous>, transform_indices = @transform_3, window_bounds = array<i64: 128, 384>}, {pipeline_mode = #tpu.pipeline_mode<synchronous>, transform_indices = @transform_4, window_bounds = array<i64: 256, 128>}, {pipeline_mode = #tpu.pipeline_mode<synchronous>, transform_indices = @transform_5, window_bounds = array<i64: 128, 128>}, {pipeline_mode = #tpu.pipeline_mode<synchronous>, transform_indices = @transform_6, window_bounds = array<i64: 3, 384>}, {pipeline_mode = #tpu.pipeline_mode<synchronous>, transform_indices = @transform_7, window_bounds = array<i64: 1, 128>}, {}, {transform_indices = @transform_9, window_bounds = array<i64: 1, 8, 128>}, {pipeline_mode = #tpu.pipeline_mode<synchronous>, transform_indices = @transform_10, window_bounds = array<i64: 8, 128>}]} {
    %c0_i32 = arith.constant 0 : i32
    %0 = arith.cmpi eq, %arg0, %c0_i32 : i32
    %1 = arith.extui %0 : i1 to i32
    %c0_i32_0 = arith.constant 0 : i32
    %2 = arith.cmpi ne, %1, %c0_i32_0 : i32
    scf.if %2 {
      %c0_84 = arith.constant 0 : index
      %c0_85 = arith.constant 0 : index
      %149 = vector.load %arg2[%c0_84, %c0_85] : memref<8x128xf32, #tpu.memory_space<vmem>>, vector<8x128xf32>
      %c0_86 = arith.constant 0 : index
      %c0_87 = arith.constant 0 : index
      %150 = vector.load %arg13[%c0_86, %c0_87] : memref<8x128xf32, #tpu.memory_space<vmem>>, vector<8x128xf32>
      tpu.vector_store %arg13[%c0_86, %c0_87], %149 {strides = array<i32>} : memref<8x128xf32, #tpu.memory_space<vmem>>, vector<8x128xf32>,
      %c0_88 = arith.constant 0 : index
      %c0_89 = arith.constant 0 : index
      %151 = memref.load %arg1[%c0_88, %c0_89] : memref<1x8xi32, #tpu.memory_space<smem>>
      %c0_i32_90 = arith.constant 0 : i32
      %c0_i32_91 = arith.constant 0 : i32
      %c0_i32_92 = arith.constant 0 : i32
      %c0_i32_93 = arith.constant 0 : i32
      %152 = tpu.memref_slice %arg10[%151, %c0_i32_93] : memref<64x128xf32, #tpu.memory_space<any>> -> memref<1x128xf32, #tpu.memory_space<any>>
      %c0_i32_94 = arith.constant 0 : i32
      %c0_i32_95 = arith.constant 0 : i32
      %153 = tpu.memref_slice %arg14[%c0_i32_90, %c0_i32_94, %c0_i32_95] : memref<2x8x128xf32, #tpu.memory_space<vmem>> -> memref<1x1x128xf32, #tpu.memory_space<vmem>>
      %154 = tpu.memref_squeeze %153 : memref<1x1x128xf32, #tpu.memory_space<vmem>> -> memref<1x128xf32, #tpu.memory_space<vmem>>
      %155 = tpu.memref_slice %arg15[%c0_i32_91, %c0_i32_92] : memref<2x8x!tpu.dma_semaphore, #tpu.memory_space<semaphore_mem>> -> memref<1x1x!tpu.dma_semaphore, #tpu.memory_space<semaphore_mem>>
      %156 = tpu.memref_squeeze %155 : memref<1x1x!tpu.dma_semaphore, #tpu.memory_space<semaphore_mem>> -> memref<!tpu.dma_semaphore, #tpu.memory_space<semaphore_mem>>
      tpu.enqueue_dma source(%152 : memref<1x128xf32, #tpu.memory_space<any>>) target(%154 : memref<1x128xf32, #tpu.memory_space<vmem>>) target_semaphore(%156 : memref<!tpu.dma_semaphore, #tpu.memory_space<semaphore_mem>>)
      %c0_96 = arith.constant 0 : index
      %c1_97 = arith.constant 1 : index
      %157 = memref.load %arg1[%c0_96, %c1_97] : memref<1x8xi32, #tpu.memory_space<smem>>
      %c0_i32_98 = arith.constant 0 : i32
      %c0_i32_99 = arith.constant 0 : i32
      %c1_i32_100 = arith.constant 1 : i32
      %c0_i32_101 = arith.constant 0 : i32
      %158 = tpu.memref_slice %arg10[%157, %c0_i32_101] : memref<64x128xf32, #tpu.memory_space<any>> -> memref<1x128xf32, #tpu.memory_space<any>>
      %c1_i32_102 = arith.constant 1 : i32
      %c0_i32_103 = arith.constant 0 : i32
      %159 = tpu.memref_slice %arg14[%c0_i32_98, %c1_i32_102, %c0_i32_103] : memref<2x8x128xf32, #tpu.memory_space<vmem>> -> memref<1x1x128xf32, #tpu.memory_space<vmem>>
      %160 = tpu.memref_squeeze %159 : memref<1x1x128xf32, #tpu.memory_space<vmem>> -> memref<1x128xf32, #tpu.memory_space<vmem>>
      %161 = tpu.memref_slice %arg15[%c0_i32_99, %c1_i32_100] : memref<2x8x!tpu.dma_semaphore, #tpu.memory_space<semaphore_mem>> -> memref<1x1x!tpu.dma_semaphore, #tpu.memory_space<semaphore_mem>>
      %162 = tpu.memref_squeeze %161 : memref<1x1x!tpu.dma_semaphore, #tpu.memory_space<semaphore_mem>> -> memref<!tpu.dma_semaphore, #tpu.memory_space<semaphore_mem>>
      tpu.enqueue_dma source(%158 : memref<1x128xf32, #tpu.memory_space<any>>) target(%160 : memref<1x128xf32, #tpu.memory_space<vmem>>) target_semaphore(%162 : memref<!tpu.dma_semaphore, #tpu.memory_space<semaphore_mem>>)
      %c0_104 = arith.constant 0 : index
      %c2_105 = arith.constant 2 : index
      %163 = memref.load %arg1[%c0_104, %c2_105] : memref<1x8xi32, #tpu.memory_space<smem>>
      %c0_i32_106 = arith.constant 0 : i32
      %c0_i32_107 = arith.constant 0 : i32
      %c2_i32_108 = arith.constant 2 : i32
      %c0_i32_109 = arith.constant 0 : i32
      %164 = tpu.memref_slice %arg10[%163, %c0_i32_109] : memref<64x128xf32, #tpu.memory_space<any>> -> memref<1x128xf32, #tpu.memory_space<any>>
      %c2_i32_110 = arith.constant 2 : i32
      %c0_i32_111 = arith.constant 0 : i32
      %165 = tpu.memref_slice %arg14[%c0_i32_106, %c2_i32_110, %c0_i32_111] : memref<2x8x128xf32, #tpu.memory_space<vmem>> -> memref<1x1x128xf32, #tpu.memory_space<vmem>>
      %166 = tpu.memref_squeeze %165 : memref<1x1x128xf32, #tpu.memory_space<vmem>> -> memref<1x128xf32, #tpu.memory_space<vmem>>
      %167 = tpu.memref_slice %arg15[%c0_i32_107, %c2_i32_108] : memref<2x8x!tpu.dma_semaphore, #tpu.memory_space<semaphore_mem>> -> memref<1x1x!tpu.dma_semaphore, #tpu.memory_space<semaphore_mem>>
      %168 = tpu.memref_squeeze %167 : memref<1x1x!tpu.dma_semaphore, #tpu.memory_space<semaphore_mem>> -> memref<!tpu.dma_semaphore, #tpu.memory_space<semaphore_mem>>
      tpu.enqueue_dma source(%164 : memref<1x128xf32, #tpu.memory_space<any>>) target(%166 : memref<1x128xf32, #tpu.memory_space<vmem>>) target_semaphore(%168 : memref<!tpu.dma_semaphore, #tpu.memory_space<semaphore_mem>>)
      %c0_112 = arith.constant 0 : index
      %c3 = arith.constant 3 : index
      %169 = memref.load %arg1[%c0_112, %c3] : memref<1x8xi32, #tpu.memory_space<smem>>
      %c0_i32_113 = arith.constant 0 : i32
      %c0_i32_114 = arith.constant 0 : i32
      %c3_i32_115 = arith.constant 3 : i32
      %c0_i32_116 = arith.constant 0 : i32
      %170 = tpu.memref_slice %arg10[%169, %c0_i32_116] : memref<64x128xf32, #tpu.memory_space<any>> -> memref<1x128xf32, #tpu.memory_space<any>>
      %c3_i32_117 = arith.constant 3 : i32
      %c0_i32_118 = arith.constant 0 : i32
      %171 = tpu.memref_slice %arg14[%c0_i32_113, %c3_i32_117, %c0_i32_118] : memref<2x8x128xf32, #tpu.memory_space<vmem>> -> memref<1x1x128xf32, #tpu.memory_space<vmem>>
      %172 = tpu.memref_squeeze %171 : memref<1x1x128xf32, #tpu.memory_space<vmem>> -> memref<1x128xf32, #tpu.memory_space<vmem>>
      %173 = tpu.memref_slice %arg15[%c0_i32_114, %c3_i32_115] : memref<2x8x!tpu.dma_semaphore, #tpu.memory_space<semaphore_mem>> -> memref<1x1x!tpu.dma_semaphore, #tpu.memory_space<semaphore_mem>>
      %174 = tpu.memref_squeeze %173 : memref<1x1x!tpu.dma_semaphore, #tpu.memory_space<semaphore_mem>> -> memref<!tpu.dma_semaphore, #tpu.memory_space<semaphore_mem>>
      tpu.enqueue_dma source(%170 : memref<1x128xf32, #tpu.memory_space<any>>) target(%172 : memref<1x128xf32, #tpu.memory_space<vmem>>) target_semaphore(%174 : memref<!tpu.dma_semaphore, #tpu.memory_space<semaphore_mem>>)
      %c0_119 = arith.constant 0 : index
      %c4 = arith.constant 4 : index
      %175 = memref.load %arg1[%c0_119, %c4] : memref<1x8xi32, #tpu.memory_space<smem>>
      %c0_i32_120 = arith.constant 0 : i32
      %c0_i32_121 = arith.constant 0 : i32
      %c4_i32_122 = arith.constant 4 : i32
      %c0_i32_123 = arith.constant 0 : i32
      %176 = tpu.memref_slice %arg10[%175, %c0_i32_123] : memref<64x128xf32, #tpu.memory_space<any>> -> memref<1x128xf32, #tpu.memory_space<any>>
      %c4_i32_124 = arith.constant 4 : i32
      %c0_i32_125 = arith.constant 0 : i32
      %177 = tpu.memref_slice %arg14[%c0_i32_120, %c4_i32_124, %c0_i32_125] : memref<2x8x128xf32, #tpu.memory_space<vmem>> -> memref<1x1x128xf32, #tpu.memory_space<vmem>>
      %178 = tpu.memref_squeeze %177 : memref<1x1x128xf32, #tpu.memory_space<vmem>> -> memref<1x128xf32, #tpu.memory_space<vmem>>
      %179 = tpu.memref_slice %arg15[%c0_i32_121, %c4_i32_122] : memref<2x8x!tpu.dma_semaphore, #tpu.memory_space<semaphore_mem>> -> memref<1x1x!tpu.dma_semaphore, #tpu.memory_space<semaphore_mem>>
      %180 = tpu.memref_squeeze %179 : memref<1x1x!tpu.dma_semaphore, #tpu.memory_space<semaphore_mem>> -> memref<!tpu.dma_semaphore, #tpu.memory_space<semaphore_mem>>
      tpu.enqueue_dma source(%176 : memref<1x128xf32, #tpu.memory_space<any>>) target(%178 : memref<1x128xf32, #tpu.memory_space<vmem>>) target_semaphore(%180 : memref<!tpu.dma_semaphore, #tpu.memory_space<semaphore_mem>>)
      %c0_126 = arith.constant 0 : index
      %c5 = arith.constant 5 : index
      %181 = memref.load %arg1[%c0_126, %c5] : memref<1x8xi32, #tpu.memory_space<smem>>
      %c0_i32_127 = arith.constant 0 : i32
      %c0_i32_128 = arith.constant 0 : i32
      %c5_i32_129 = arith.constant 5 : i32
      %c0_i32_130 = arith.constant 0 : i32
      %182 = tpu.memref_slice %arg10[%181, %c0_i32_130] : memref<64x128xf32, #tpu.memory_space<any>> -> memref<1x128xf32, #tpu.memory_space<any>>
      %c5_i32_131 = arith.constant 5 : i32
      %c0_i32_132 = arith.constant 0 : i32
      %183 = tpu.memref_slice %arg14[%c0_i32_127, %c5_i32_131, %c0_i32_132] : memref<2x8x128xf32, #tpu.memory_space<vmem>> -> memref<1x1x128xf32, #tpu.memory_space<vmem>>
      %184 = tpu.memref_squeeze %183 : memref<1x1x128xf32, #tpu.memory_space<vmem>> -> memref<1x128xf32, #tpu.memory_space<vmem>>
      %185 = tpu.memref_slice %arg15[%c0_i32_128, %c5_i32_129] : memref<2x8x!tpu.dma_semaphore, #tpu.memory_space<semaphore_mem>> -> memref<1x1x!tpu.dma_semaphore, #tpu.memory_space<semaphore_mem>>
      %186 = tpu.memref_squeeze %185 : memref<1x1x!tpu.dma_semaphore, #tpu.memory_space<semaphore_mem>> -> memref<!tpu.dma_semaphore, #tpu.memory_space<semaphore_mem>>
      tpu.enqueue_dma source(%182 : memref<1x128xf32, #tpu.memory_space<any>>) target(%184 : memref<1x128xf32, #tpu.memory_space<vmem>>) target_semaphore(%186 : memref<!tpu.dma_semaphore, #tpu.memory_space<semaphore_mem>>)
      %c0_133 = arith.constant 0 : index
      %c6 = arith.constant 6 : index
      %187 = memref.load %arg1[%c0_133, %c6] : memref<1x8xi32, #tpu.memory_space<smem>>
      %c0_i32_134 = arith.constant 0 : i32
      %c0_i32_135 = arith.constant 0 : i32
      %c6_i32_136 = arith.constant 6 : i32
      %c0_i32_137 = arith.constant 0 : i32
      %188 = tpu.memref_slice %arg10[%187, %c0_i32_137] : memref<64x128xf32, #tpu.memory_space<any>> -> memref<1x128xf32, #tpu.memory_space<any>>
      %c6_i32_138 = arith.constant 6 : i32
      %c0_i32_139 = arith.constant 0 : i32
      %189 = tpu.memref_slice %arg14[%c0_i32_134, %c6_i32_138, %c0_i32_139] : memref<2x8x128xf32, #tpu.memory_space<vmem>> -> memref<1x1x128xf32, #tpu.memory_space<vmem>>
      %190 = tpu.memref_squeeze %189 : memref<1x1x128xf32, #tpu.memory_space<vmem>> -> memref<1x128xf32, #tpu.memory_space<vmem>>
      %191 = tpu.memref_slice %arg15[%c0_i32_135, %c6_i32_136] : memref<2x8x!tpu.dma_semaphore, #tpu.memory_space<semaphore_mem>> -> memref<1x1x!tpu.dma_semaphore, #tpu.memory_space<semaphore_mem>>
      %192 = tpu.memref_squeeze %191 : memref<1x1x!tpu.dma_semaphore, #tpu.memory_space<semaphore_mem>> -> memref<!tpu.dma_semaphore, #tpu.memory_space<semaphore_mem>>
      tpu.enqueue_dma source(%188 : memref<1x128xf32, #tpu.memory_space<any>>) target(%190 : memref<1x128xf32, #tpu.memory_space<vmem>>) target_semaphore(%192 : memref<!tpu.dma_semaphore, #tpu.memory_space<semaphore_mem>>)
      %c0_140 = arith.constant 0 : index
      %c7 = arith.constant 7 : index
      %193 = memref.load %arg1[%c0_140, %c7] : memref<1x8xi32, #tpu.memory_space<smem>>
      %c0_i32_141 = arith.constant 0 : i32
      %c0_i32_142 = arith.constant 0 : i32
      %c7_i32_143 = arith.constant 7 : i32
      %c0_i32_144 = arith.constant 0 : i32
      %194 = tpu.memref_slice %arg10[%193, %c0_i32_144] : memref<64x128xf32, #tpu.memory_space<any>> -> memref<1x128xf32, #tpu.memory_space<any>>
      %c7_i32_145 = arith.constant 7 : i32
      %c0_i32_146 = arith.constant 0 : i32
      %195 = tpu.memref_slice %arg14[%c0_i32_141, %c7_i32_145, %c0_i32_146] : memref<2x8x128xf32, #tpu.memory_space<vmem>> -> memref<1x1x128xf32, #tpu.memory_space<vmem>>
      %196 = tpu.memref_squeeze %195 : memref<1x1x128xf32, #tpu.memory_space<vmem>> -> memref<1x128xf32, #tpu.memory_space<vmem>>
      %197 = tpu.memref_slice %arg15[%c0_i32_142, %c7_i32_143] : memref<2x8x!tpu.dma_semaphore, #tpu.memory_space<semaphore_mem>> -> memref<1x1x!tpu.dma_semaphore, #tpu.memory_space<semaphore_mem>>
      %198 = tpu.memref_squeeze %197 : memref<1x1x!tpu.dma_semaphore, #tpu.memory_space<semaphore_mem>> -> memref<!tpu.dma_semaphore, #tpu.memory_space<semaphore_mem>>
      tpu.enqueue_dma source(%194 : memref<1x128xf32, #tpu.memory_space<any>>) target(%196 : memref<1x128xf32, #tpu.memory_space<vmem>>) target_semaphore(%198 : memref<!tpu.dma_semaphore, #tpu.memory_space<semaphore_mem>>)
    } else {
    }
    %c2_i32 = arith.constant 2 : i32
    %c0_i32_1 = arith.constant 0 : i32
    %3 = arith.cmpi eq, %c2_i32, %c0_i32_1 : i32
    %c1_i32 = arith.constant 1 : i32
    %4 = arith.select %3, %c1_i32, %c2_i32 : i32
    %5 = arith.remsi %arg0, %4 : i32
    %c0_i32_2 = arith.constant 0 : i32
    %6 = arith.cmpi ne, %5, %c0_i32_2 : i32
    %c0_i32_3 = arith.constant 0 : i32
    %7 = arith.cmpi slt, %5, %c0_i32_3 : i32
    %c0_i32_4 = arith.constant 0 : i32
    %8 = arith.cmpi slt, %4, %c0_i32_4 : i32
    %9 = arith.xori %7, %8 : i1
    %10 = arith.andi %9, %6 : i1
    %11 = arith.addi %5, %4 : i32
    %12 = arith.select %10, %11, %5 : i32
    %c0_i32_5 = arith.constant 0 : i32
    %c0_i32_6 = arith.constant 0 : i32
    %c0_i32_7 = arith.constant 0 : i32
    %13 = tpu.memref_slice %arg10[%c0_i32_6, %c0_i32_7] : memref<64x128xf32, #tpu.memory_space<any>> -> memref<1x128xf32, #tpu.memory_space<any>>
    %c0_i32_8 = arith.constant 0 : i32
    %c0_i32_9 = arith.constant 0 : i32
    %14 = tpu.memref_slice %arg14[%12, %c0_i32_8, %c0_i32_9] : memref<2x8x128xf32, #tpu.memory_space<vmem>> -> memref<1x1x128xf32, #tpu.memory_space<vmem>>
    %15 = tpu.memref_squeeze %14 : memref<1x1x128xf32, #tpu.memory_space<vmem>> -> memref<1x128xf32, #tpu.memory_space<vmem>>
    %16 = tpu.memref_slice %arg15[%12, %c0_i32_5] : memref<2x8x!tpu.dma_semaphore, #tpu.memory_space<semaphore_mem>> -> memref<1x1x!tpu.dma_semaphore, #tpu.memory_space<semaphore_mem>>
    %17 = tpu.memref_squeeze %16 : memref<1x1x!tpu.dma_semaphore, #tpu.memory_space<semaphore_mem>> -> memref<!tpu.dma_semaphore, #tpu.memory_space<semaphore_mem>>
    tpu.wait_dma2 semaphore(%17 : memref<!tpu.dma_semaphore, #tpu.memory_space<semaphore_mem>>) src(%13 : memref<1x128xf32, #tpu.memory_space<any>>) dst(%15 : memref<1x128xf32, #tpu.memory_space<vmem>>)
    %c1_i32_10 = arith.constant 1 : i32
    %c0_i32_11 = arith.constant 0 : i32
    %c0_i32_12 = arith.constant 0 : i32
    %18 = tpu.memref_slice %arg10[%c0_i32_11, %c0_i32_12] : memref<64x128xf32, #tpu.memory_space<any>> -> memref<1x128xf32, #tpu.memory_space<any>>
    %c1_i32_13 = arith.constant 1 : i32
    %c0_i32_14 = arith.constant 0 : i32
    %19 = tpu.memref_slice %arg14[%12, %c1_i32_13, %c0_i32_14] : memref<2x8x128xf32, #tpu.memory_space<vmem>> -> memref<1x1x128xf32, #tpu.memory_space<vmem>>
    %20 = tpu.memref_squeeze %19 : memref<1x1x128xf32, #tpu.memory_space<vmem>> -> memref<1x128xf32, #tpu.memory_space<vmem>>
    %21 = tpu.memref_slice %arg15[%12, %c1_i32_10] : memref<2x8x!tpu.dma_semaphore, #tpu.memory_space<semaphore_mem>> -> memref<1x1x!tpu.dma_semaphore, #tpu.memory_space<semaphore_mem>>
    %22 = tpu.memref_squeeze %21 : memref<1x1x!tpu.dma_semaphore, #tpu.memory_space<semaphore_mem>> -> memref<!tpu.dma_semaphore, #tpu.memory_space<semaphore_mem>>
    tpu.wait_dma2 semaphore(%22 : memref<!tpu.dma_semaphore, #tpu.memory_space<semaphore_mem>>) src(%18 : memref<1x128xf32, #tpu.memory_space<any>>) dst(%20 : memref<1x128xf32, #tpu.memory_space<vmem>>)
    %c2_i32_15 = arith.constant 2 : i32
    %c0_i32_16 = arith.constant 0 : i32
    %c0_i32_17 = arith.constant 0 : i32
    %23 = tpu.memref_slice %arg10[%c0_i32_16, %c0_i32_17] : memref<64x128xf32, #tpu.memory_space<any>> -> memref<1x128xf32, #tpu.memory_space<any>>
    %c2_i32_18 = arith.constant 2 : i32
    %c0_i32_19 = arith.constant 0 : i32
    %24 = tpu.memref_slice %arg14[%12, %c2_i32_18, %c0_i32_19] : memref<2x8x128xf32, #tpu.memory_space<vmem>> -> memref<1x1x128xf32, #tpu.memory_space<vmem>>
    %25 = tpu.memref_squeeze %24 : memref<1x1x128xf32, #tpu.memory_space<vmem>> -> memref<1x128xf32, #tpu.memory_space<vmem>>
    %26 = tpu.memref_slice %arg15[%12, %c2_i32_15] : memref<2x8x!tpu.dma_semaphore, #tpu.memory_space<semaphore_mem>> -> memref<1x1x!tpu.dma_semaphore, #tpu.memory_space<semaphore_mem>>
    %27 = tpu.memref_squeeze %26 : memref<1x1x!tpu.dma_semaphore, #tpu.memory_space<semaphore_mem>> -> memref<!tpu.dma_semaphore, #tpu.memory_space<semaphore_mem>>
    tpu.wait_dma2 semaphore(%27 : memref<!tpu.dma_semaphore, #tpu.memory_space<semaphore_mem>>) src(%23 : memref<1x128xf32, #tpu.memory_space<any>>) dst(%25 : memref<1x128xf32, #tpu.memory_space<vmem>>)
    %c3_i32 = arith.constant 3 : i32
    %c0_i32_20 = arith.constant 0 : i32
    %c0_i32_21 = arith.constant 0 : i32
    %28 = tpu.memref_slice %arg10[%c0_i32_20, %c0_i32_21] : memref<64x128xf32, #tpu.memory_space<any>> -> memref<1x128xf32, #tpu.memory_space<any>>
    %c3_i32_22 = arith.constant 3 : i32
    %c0_i32_23 = arith.constant 0 : i32
    %29 = tpu.memref_slice %arg14[%12, %c3_i32_22, %c0_i32_23] : memref<2x8x128xf32, #tpu.memory_space<vmem>> -> memref<1x1x128xf32, #tpu.memory_space<vmem>>
    %30 = tpu.memref_squeeze %29 : memref<1x1x128xf32, #tpu.memory_space<vmem>> -> memref<1x128xf32, #tpu.memory_space<vmem>>
    %31 = tpu.memref_slice %arg15[%12, %c3_i32] : memref<2x8x!tpu.dma_semaphore, #tpu.memory_space<semaphore_mem>> -> memref<1x1x!tpu.dma_semaphore, #tpu.memory_space<semaphore_mem>>
    %32 = tpu.memref_squeeze %31 : memref<1x1x!tpu.dma_semaphore, #tpu.memory_space<semaphore_mem>> -> memref<!tpu.dma_semaphore, #tpu.memory_space<semaphore_mem>>
    tpu.wait_dma2 semaphore(%32 : memref<!tpu.dma_semaphore, #tpu.memory_space<semaphore_mem>>) src(%28 : memref<1x128xf32, #tpu.memory_space<any>>) dst(%30 : memref<1x128xf32, #tpu.memory_space<vmem>>)
    %c4_i32 = arith.constant 4 : i32
    %c0_i32_24 = arith.constant 0 : i32
    %c0_i32_25 = arith.constant 0 : i32
    %33 = tpu.memref_slice %arg10[%c0_i32_24, %c0_i32_25] : memref<64x128xf32, #tpu.memory_space<any>> -> memref<1x128xf32, #tpu.memory_space<any>>
    %c4_i32_26 = arith.constant 4 : i32
    %c0_i32_27 = arith.constant 0 : i32
    %34 = tpu.memref_slice %arg14[%12, %c4_i32_26, %c0_i32_27] : memref<2x8x128xf32, #tpu.memory_space<vmem>> -> memref<1x1x128xf32, #tpu.memory_space<vmem>>
    %35 = tpu.memref_squeeze %34 : memref<1x1x128xf32, #tpu.memory_space<vmem>> -> memref<1x128xf32, #tpu.memory_space<vmem>>
    %36 = tpu.memref_slice %arg15[%12, %c4_i32] : memref<2x8x!tpu.dma_semaphore, #tpu.memory_space<semaphore_mem>> -> memref<1x1x!tpu.dma_semaphore, #tpu.memory_space<semaphore_mem>>
    %37 = tpu.memref_squeeze %36 : memref<1x1x!tpu.dma_semaphore, #tpu.memory_space<semaphore_mem>> -> memref<!tpu.dma_semaphore, #tpu.memory_space<semaphore_mem>>
    tpu.wait_dma2 semaphore(%37 : memref<!tpu.dma_semaphore, #tpu.memory_space<semaphore_mem>>) src(%33 : memref<1x128xf32, #tpu.memory_space<any>>) dst(%35 : memref<1x128xf32, #tpu.memory_space<vmem>>)
    %c5_i32 = arith.constant 5 : i32
    %c0_i32_28 = arith.constant 0 : i32
    %c0_i32_29 = arith.constant 0 : i32
    %38 = tpu.memref_slice %arg10[%c0_i32_28, %c0_i32_29] : memref<64x128xf32, #tpu.memory_space<any>> -> memref<1x128xf32, #tpu.memory_space<any>>
    %c5_i32_30 = arith.constant 5 : i32
    %c0_i32_31 = arith.constant 0 : i32
    %39 = tpu.memref_slice %arg14[%12, %c5_i32_30, %c0_i32_31] : memref<2x8x128xf32, #tpu.memory_space<vmem>> -> memref<1x1x128xf32, #tpu.memory_space<vmem>>
    %40 = tpu.memref_squeeze %39 : memref<1x1x128xf32, #tpu.memory_space<vmem>> -> memref<1x128xf32, #tpu.memory_space<vmem>>
    %41 = tpu.memref_slice %arg15[%12, %c5_i32] : memref<2x8x!tpu.dma_semaphore, #tpu.memory_space<semaphore_mem>> -> memref<1x1x!tpu.dma_semaphore, #tpu.memory_space<semaphore_mem>>
    %42 = tpu.memref_squeeze %41 : memref<1x1x!tpu.dma_semaphore, #tpu.memory_space<semaphore_mem>> -> memref<!tpu.dma_semaphore, #tpu.memory_space<semaphore_mem>>
    tpu.wait_dma2 semaphore(%42 : memref<!tpu.dma_semaphore, #tpu.memory_space<semaphore_mem>>) src(%38 : memref<1x128xf32, #tpu.memory_space<any>>) dst(%40 : memref<1x128xf32, #tpu.memory_space<vmem>>)
    %c6_i32 = arith.constant 6 : i32
    %c0_i32_32 = arith.constant 0 : i32
    %c0_i32_33 = arith.constant 0 : i32
    %43 = tpu.memref_slice %arg10[%c0_i32_32, %c0_i32_33] : memref<64x128xf32, #tpu.memory_space<any>> -> memref<1x128xf32, #tpu.memory_space<any>>
    %c6_i32_34 = arith.constant 6 : i32
    %c0_i32_35 = arith.constant 0 : i32
    %44 = tpu.memref_slice %arg14[%12, %c6_i32_34, %c0_i32_35] : memref<2x8x128xf32, #tpu.memory_space<vmem>> -> memref<1x1x128xf32, #tpu.memory_space<vmem>>
    %45 = tpu.memref_squeeze %44 : memref<1x1x128xf32, #tpu.memory_space<vmem>> -> memref<1x128xf32, #tpu.memory_space<vmem>>
    %46 = tpu.memref_slice %arg15[%12, %c6_i32] : memref<2x8x!tpu.dma_semaphore, #tpu.memory_space<semaphore_mem>> -> memref<1x1x!tpu.dma_semaphore, #tpu.memory_space<semaphore_mem>>
    %47 = tpu.memref_squeeze %46 : memref<1x1x!tpu.dma_semaphore, #tpu.memory_space<semaphore_mem>> -> memref<!tpu.dma_semaphore, #tpu.memory_space<semaphore_mem>>
    tpu.wait_dma2 semaphore(%47 : memref<!tpu.dma_semaphore, #tpu.memory_space<semaphore_mem>>) src(%43 : memref<1x128xf32, #tpu.memory_space<any>>) dst(%45 : memref<1x128xf32, #tpu.memory_space<vmem>>)
    %c7_i32 = arith.constant 7 : i32
    %c0_i32_36 = arith.constant 0 : i32
    %c0_i32_37 = arith.constant 0 : i32
    %48 = tpu.memref_slice %arg10[%c0_i32_36, %c0_i32_37] : memref<64x128xf32, #tpu.memory_space<any>> -> memref<1x128xf32, #tpu.memory_space<any>>
    %c7_i32_38 = arith.constant 7 : i32
    %c0_i32_39 = arith.constant 0 : i32
    %49 = tpu.memref_slice %arg14[%12, %c7_i32_38, %c0_i32_39] : memref<2x8x128xf32, #tpu.memory_space<vmem>> -> memref<1x1x128xf32, #tpu.memory_space<vmem>>
    %50 = tpu.memref_squeeze %49 : memref<1x1x128xf32, #tpu.memory_space<vmem>> -> memref<1x128xf32, #tpu.memory_space<vmem>>
    %51 = tpu.memref_slice %arg15[%12, %c7_i32] : memref<2x8x!tpu.dma_semaphore, #tpu.memory_space<semaphore_mem>> -> memref<1x1x!tpu.dma_semaphore, #tpu.memory_space<semaphore_mem>>
    %52 = tpu.memref_squeeze %51 : memref<1x1x!tpu.dma_semaphore, #tpu.memory_space<semaphore_mem>> -> memref<!tpu.dma_semaphore, #tpu.memory_space<semaphore_mem>>
    tpu.wait_dma2 semaphore(%52 : memref<!tpu.dma_semaphore, #tpu.memory_space<semaphore_mem>>) src(%48 : memref<1x128xf32, #tpu.memory_space<any>>) dst(%50 : memref<1x128xf32, #tpu.memory_space<vmem>>)
    %c1_i32_40 = arith.constant 1 : i32
    %53 = arith.addi %arg0, %c1_i32_40 : i32
    %c1_i32_41 = arith.constant 1 : i32
    %54 = arith.cmpi slt, %53, %c1_i32_41 : i32
    %55 = arith.extui %54 : i1 to i32
    %c0_i32_42 = arith.constant 0 : i32
    %56 = arith.cmpi ne, %55, %c0_i32_42 : i32
    scf.if %56 {
      %c1_i32_84 = arith.constant 1 : i32
      %149 = arith.addi %arg0, %c1_i32_84 : i32
      %c1_i32_85 = arith.constant 1 : i32
      %150 = arith.subi %c1_i32_85, %12 : i32
      %151 = arith.index_cast %149 : i32 to index
      %c0_86 = arith.constant 0 : index
      %152 = memref.load %arg1[%151, %c0_86] : memref<1x8xi32, #tpu.memory_space<smem>>
      %c0_i32_87 = arith.constant 0 : i32
      %c0_i32_88 = arith.constant 0 : i32
      %153 = tpu.memref_slice %arg10[%152, %c0_i32_88] : memref<64x128xf32, #tpu.memory_space<any>> -> memref<1x128xf32, #tpu.memory_space<any>>
      %c0_i32_89 = arith.constant 0 : i32
      %c0_i32_90 = arith.constant 0 : i32
      %154 = tpu.memref_slice %arg14[%150, %c0_i32_89, %c0_i32_90] : memref<2x8x128xf32, #tpu.memory_space<vmem>> -> memref<1x1x128xf32, #tpu.memory_space<vmem>>
      %155 = tpu.memref_squeeze %154 : memref<1x1x128xf32, #tpu.memory_space<vmem>> -> memref<1x128xf32, #tpu.memory_space<vmem>>
      %156 = tpu.memref_slice %arg15[%150, %c0_i32_87] : memref<2x8x!tpu.dma_semaphore, #tpu.memory_space<semaphore_mem>> -> memref<1x1x!tpu.dma_semaphore, #tpu.memory_space<semaphore_mem>>
      %157 = tpu.memref_squeeze %156 : memref<1x1x!tpu.dma_semaphore, #tpu.memory_space<semaphore_mem>> -> memref<!tpu.dma_semaphore, #tpu.memory_space<semaphore_mem>>
      tpu.enqueue_dma source(%153 : memref<1x128xf32, #tpu.memory_space<any>>) target(%155 : memref<1x128xf32, #tpu.memory_space<vmem>>) target_semaphore(%157 : memref<!tpu.dma_semaphore, #tpu.memory_space<semaphore_mem>>)
      %158 = arith.index_cast %149 : i32 to index
      %c1_91 = arith.constant 1 : index
      %159 = memref.load %arg1[%158, %c1_91] : memref<1x8xi32, #tpu.memory_space<smem>>
      %c1_i32_92 = arith.constant 1 : i32
      %c0_i32_93 = arith.constant 0 : i32
      %160 = tpu.memref_slice %arg10[%159, %c0_i32_93] : memref<64x128xf32, #tpu.memory_space<any>> -> memref<1x128xf32, #tpu.memory_space<any>>
      %c1_i32_94 = arith.constant 1 : i32
      %c0_i32_95 = arith.constant 0 : i32
      %161 = tpu.memref_slice %arg14[%150, %c1_i32_94, %c0_i32_95] : memref<2x8x128xf32, #tpu.memory_space<vmem>> -> memref<1x1x128xf32, #tpu.memory_space<vmem>>
      %162 = tpu.memref_squeeze %161 : memref<1x1x128xf32, #tpu.memory_space<vmem>> -> memref<1x128xf32, #tpu.memory_space<vmem>>
      %163 = tpu.memref_slice %arg15[%150, %c1_i32_92] : memref<2x8x!tpu.dma_semaphore, #tpu.memory_space<semaphore_mem>> -> memref<1x1x!tpu.dma_semaphore, #tpu.memory_space<semaphore_mem>>
      %164 = tpu.memref_squeeze %163 : memref<1x1x!tpu.dma_semaphore, #tpu.memory_space<semaphore_mem>> -> memref<!tpu.dma_semaphore, #tpu.memory_space<semaphore_mem>>
      tpu.enqueue_dma source(%160 : memref<1x128xf32, #tpu.memory_space<any>>) target(%162 : memref<1x128xf32, #tpu.memory_space<vmem>>) target_semaphore(%164 : memref<!tpu.dma_semaphore, #tpu.memory_space<semaphore_mem>>)
      %165 = arith.index_cast %149 : i32 to index
      %c2_96 = arith.constant 2 : index
      %166 = memref.load %arg1[%165, %c2_96] : memref<1x8xi32, #tpu.memory_space<smem>>
      %c2_i32_97 = arith.constant 2 : i32
      %c0_i32_98 = arith.constant 0 : i32
      %167 = tpu.memref_slice %arg10[%166, %c0_i32_98] : memref<64x128xf32, #tpu.memory_space<any>> -> memref<1x128xf32, #tpu.memory_space<any>>
      %c2_i32_99 = arith.constant 2 : i32
      %c0_i32_100 = arith.constant 0 : i32
      %168 = tpu.memref_slice %arg14[%150, %c2_i32_99, %c0_i32_100] : memref<2x8x128xf32, #tpu.memory_space<vmem>> -> memref<1x1x128xf32, #tpu.memory_space<vmem>>
      %169 = tpu.memref_squeeze %168 : memref<1x1x128xf32, #tpu.memory_space<vmem>> -> memref<1x128xf32, #tpu.memory_space<vmem>>
      %170 = tpu.memref_slice %arg15[%150, %c2_i32_97] : memref<2x8x!tpu.dma_semaphore, #tpu.memory_space<semaphore_mem>> -> memref<1x1x!tpu.dma_semaphore, #tpu.memory_space<semaphore_mem>>
      %171 = tpu.memref_squeeze %170 : memref<1x1x!tpu.dma_semaphore, #tpu.memory_space<semaphore_mem>> -> memref<!tpu.dma_semaphore, #tpu.memory_space<semaphore_mem>>
      tpu.enqueue_dma source(%167 : memref<1x128xf32, #tpu.memory_space<any>>) target(%169 : memref<1x128xf32, #tpu.memory_space<vmem>>) target_semaphore(%171 : memref<!tpu.dma_semaphore, #tpu.memory_space<semaphore_mem>>)
      %172 = arith.index_cast %149 : i32 to index
      %c3 = arith.constant 3 : index
      %173 = memref.load %arg1[%172, %c3] : memref<1x8xi32, #tpu.memory_space<smem>>
      %c3_i32_101 = arith.constant 3 : i32
      %c0_i32_102 = arith.constant 0 : i32
      %174 = tpu.memref_slice %arg10[%173, %c0_i32_102] : memref<64x128xf32, #tpu.memory_space<any>> -> memref<1x128xf32, #tpu.memory_space<any>>
      %c3_i32_103 = arith.constant 3 : i32
      %c0_i32_104 = arith.constant 0 : i32
      %175 = tpu.memref_slice %arg14[%150, %c3_i32_103, %c0_i32_104] : memref<2x8x128xf32, #tpu.memory_space<vmem>> -> memref<1x1x128xf32, #tpu.memory_space<vmem>>
      %176 = tpu.memref_squeeze %175 : memref<1x1x128xf32, #tpu.memory_space<vmem>> -> memref<1x128xf32, #tpu.memory_space<vmem>>
      %177 = tpu.memref_slice %arg15[%150, %c3_i32_101] : memref<2x8x!tpu.dma_semaphore, #tpu.memory_space<semaphore_mem>> -> memref<1x1x!tpu.dma_semaphore, #tpu.memory_space<semaphore_mem>>
      %178 = tpu.memref_squeeze %177 : memref<1x1x!tpu.dma_semaphore, #tpu.memory_space<semaphore_mem>> -> memref<!tpu.dma_semaphore, #tpu.memory_space<semaphore_mem>>
      tpu.enqueue_dma source(%174 : memref<1x128xf32, #tpu.memory_space<any>>) target(%176 : memref<1x128xf32, #tpu.memory_space<vmem>>) target_semaphore(%178 : memref<!tpu.dma_semaphore, #tpu.memory_space<semaphore_mem>>)
      %179 = arith.index_cast %149 : i32 to index
      %c4 = arith.constant 4 : index
      %180 = memref.load %arg1[%179, %c4] : memref<1x8xi32, #tpu.memory_space<smem>>
      %c4_i32_105 = arith.constant 4 : i32
      %c0_i32_106 = arith.constant 0 : i32
      %181 = tpu.memref_slice %arg10[%180, %c0_i32_106] : memref<64x128xf32, #tpu.memory_space<any>> -> memref<1x128xf32, #tpu.memory_space<any>>
      %c4_i32_107 = arith.constant 4 : i32
      %c0_i32_108 = arith.constant 0 : i32
      %182 = tpu.memref_slice %arg14[%150, %c4_i32_107, %c0_i32_108] : memref<2x8x128xf32, #tpu.memory_space<vmem>> -> memref<1x1x128xf32, #tpu.memory_space<vmem>>
      %183 = tpu.memref_squeeze %182 : memref<1x1x128xf32, #tpu.memory_space<vmem>> -> memref<1x128xf32, #tpu.memory_space<vmem>>
      %184 = tpu.memref_slice %arg15[%150, %c4_i32_105] : memref<2x8x!tpu.dma_semaphore, #tpu.memory_space<semaphore_mem>> -> memref<1x1x!tpu.dma_semaphore, #tpu.memory_space<semaphore_mem>>
      %185 = tpu.memref_squeeze %184 : memref<1x1x!tpu.dma_semaphore, #tpu.memory_space<semaphore_mem>> -> memref<!tpu.dma_semaphore, #tpu.memory_space<semaphore_mem>>
      tpu.enqueue_dma source(%181 : memref<1x128xf32, #tpu.memory_space<any>>) target(%183 : memref<1x128xf32, #tpu.memory_space<vmem>>) target_semaphore(%185 : memref<!tpu.dma_semaphore, #tpu.memory_space<semaphore_mem>>)
      %186 = arith.index_cast %149 : i32 to index
      %c5 = arith.constant 5 : index
      %187 = memref.load %arg1[%186, %c5] : memref<1x8xi32, #tpu.memory_space<smem>>
      %c5_i32_109 = arith.constant 5 : i32
      %c0_i32_110 = arith.constant 0 : i32
      %188 = tpu.memref_slice %arg10[%187, %c0_i32_110] : memref<64x128xf32, #tpu.memory_space<any>> -> memref<1x128xf32, #tpu.memory_space<any>>
      %c5_i32_111 = arith.constant 5 : i32
      %c0_i32_112 = arith.constant 0 : i32
      %189 = tpu.memref_slice %arg14[%150, %c5_i32_111, %c0_i32_112] : memref<2x8x128xf32, #tpu.memory_space<vmem>> -> memref<1x1x128xf32, #tpu.memory_space<vmem>>
      %190 = tpu.memref_squeeze %189 : memref<1x1x128xf32, #tpu.memory_space<vmem>> -> memref<1x128xf32, #tpu.memory_space<vmem>>
      %191 = tpu.memref_slice %arg15[%150, %c5_i32_109] : memref<2x8x!tpu.dma_semaphore, #tpu.memory_space<semaphore_mem>> -> memref<1x1x!tpu.dma_semaphore, #tpu.memory_space<semaphore_mem>>
      %192 = tpu.memref_squeeze %191 : memref<1x1x!tpu.dma_semaphore, #tpu.memory_space<semaphore_mem>> -> memref<!tpu.dma_semaphore, #tpu.memory_space<semaphore_mem>>
      tpu.enqueue_dma source(%188 : memref<1x128xf32, #tpu.memory_space<any>>) target(%190 : memref<1x128xf32, #tpu.memory_space<vmem>>) target_semaphore(%192 : memref<!tpu.dma_semaphore, #tpu.memory_space<semaphore_mem>>)
      %193 = arith.index_cast %149 : i32 to index
      %c6 = arith.constant 6 : index
      %194 = memref.load %arg1[%193, %c6] : memref<1x8xi32, #tpu.memory_space<smem>>
      %c6_i32_113 = arith.constant 6 : i32
      %c0_i32_114 = arith.constant 0 : i32
      %195 = tpu.memref_slice %arg10[%194, %c0_i32_114] : memref<64x128xf32, #tpu.memory_space<any>> -> memref<1x128xf32, #tpu.memory_space<any>>
      %c6_i32_115 = arith.constant 6 : i32
      %c0_i32_116 = arith.constant 0 : i32
      %196 = tpu.memref_slice %arg14[%150, %c6_i32_115, %c0_i32_116] : memref<2x8x128xf32, #tpu.memory_space<vmem>> -> memref<1x1x128xf32, #tpu.memory_space<vmem>>
      %197 = tpu.memref_squeeze %196 : memref<1x1x128xf32, #tpu.memory_space<vmem>> -> memref<1x128xf32, #tpu.memory_space<vmem>>
      %198 = tpu.memref_slice %arg15[%150, %c6_i32_113] : memref<2x8x!tpu.dma_semaphore, #tpu.memory_space<semaphore_mem>> -> memref<1x1x!tpu.dma_semaphore, #tpu.memory_space<semaphore_mem>>
      %199 = tpu.memref_squeeze %198 : memref<1x1x!tpu.dma_semaphore, #tpu.memory_space<semaphore_mem>> -> memref<!tpu.dma_semaphore, #tpu.memory_space<semaphore_mem>>
      tpu.enqueue_dma source(%195 : memref<1x128xf32, #tpu.memory_space<any>>) target(%197 : memref<1x128xf32, #tpu.memory_space<vmem>>) target_semaphore(%199 : memref<!tpu.dma_semaphore, #tpu.memory_space<semaphore_mem>>)
      %200 = arith.index_cast %149 : i32 to index
      %c7 = arith.constant 7 : index
      %201 = memref.load %arg1[%200, %c7] : memref<1x8xi32, #tpu.memory_space<smem>>
      %c7_i32_117 = arith.constant 7 : i32
      %c0_i32_118 = arith.constant 0 : i32
      %202 = tpu.memref_slice %arg10[%201, %c0_i32_118] : memref<64x128xf32, #tpu.memory_space<any>> -> memref<1x128xf32, #tpu.memory_space<any>>
      %c7_i32_119 = arith.constant 7 : i32
      %c0_i32_120 = arith.constant 0 : i32
      %203 = tpu.memref_slice %arg14[%150, %c7_i32_119, %c0_i32_120] : memref<2x8x128xf32, #tpu.memory_space<vmem>> -> memref<1x1x128xf32, #tpu.memory_space<vmem>>
      %204 = tpu.memref_squeeze %203 : memref<1x1x128xf32, #tpu.memory_space<vmem>> -> memref<1x128xf32, #tpu.memory_space<vmem>>
      %205 = tpu.memref_slice %arg15[%150, %c7_i32_117] : memref<2x8x!tpu.dma_semaphore, #tpu.memory_space<semaphore_mem>> -> memref<1x1x!tpu.dma_semaphore, #tpu.memory_space<semaphore_mem>>
      %206 = tpu.memref_squeeze %205 : memref<1x1x!tpu.dma_semaphore, #tpu.memory_space<semaphore_mem>> -> memref<!tpu.dma_semaphore, #tpu.memory_space<semaphore_mem>>
      tpu.enqueue_dma source(%202 : memref<1x128xf32, #tpu.memory_space<any>>) target(%204 : memref<1x128xf32, #tpu.memory_space<vmem>>) target_semaphore(%206 : memref<!tpu.dma_semaphore, #tpu.memory_space<semaphore_mem>>)
    } else {
    }
    %57 = arith.index_cast %12 : i32 to index
    %c0 = arith.constant 0 : index
    %c0_43 = arith.constant 0 : index
    %58 = vector.load %arg14[%57, %c0, %c0_43] : memref<2x8x128xf32, #tpu.memory_space<vmem>>, vector<1x8x128xf32>
    %59 = vector.shape_cast %58 : vector<1x8x128xf32> to vector<8x128xf32>
    %c0_44 = arith.constant 0 : index
    %c0_45 = arith.constant 0 : index
    %60 = vector.load %arg13[%c0_44, %c0_45] : memref<8x128xf32, #tpu.memory_space<vmem>>, vector<8x128xf32>
    %61 = arith.truncf %59 : vector<8x128xf32> to vector<8x128xbf16>
    %c0_46 = arith.constant 0 : index
    %c0_47 = arith.constant 0 : index
    %62 = vector.load %arg4[%c0_46, %c0_47] : memref<128x384xbf16, #tpu.memory_space<vmem>>, vector<128x384xbf16>
    %cst = arith.constant dense<0.000000e+00> : vector<8x384xf32>
    %63 = tpu.matmul %61, %62, %cst {dimension_numbers = #tpu.dot_dimension_numbers<[1], [0], [0], [1], [0, 0, 1, 1], [], []>} : vector<8x128xbf16>, vector<128x384xbf16>, vector<8x384xf32> -> vector<8x384xf32>
    %c0_48 = arith.constant 0 : index
    %c0_49 = arith.constant 0 : index
    %64 = vector.load %arg8[%c0_48, %c0_49] : memref<3x384xf32, #tpu.memory_space<vmem>>, vector<1x384xf32>
    %65 = vector.broadcast %64 : vector<1x384xf32> to vector<8x384xf32>
    %66 = arith.addf %63, %65 : vector<8x384xf32>
    %67 = arith.truncf %60 : vector<8x128xf32> to vector<8x128xbf16>
    %c0_50 = arith.constant 0 : index
    %c0_51 = arith.constant 0 : index
    %68 = vector.load %arg5[%c0_50, %c0_51] : memref<128x384xbf16, #tpu.memory_space<vmem>>, vector<128x384xbf16>
    %cst_52 = arith.constant dense<0.000000e+00> : vector<8x384xf32>
    %69 = tpu.matmul %67, %68, %cst_52 {dimension_numbers = #tpu.dot_dimension_numbers<[1], [0], [0], [1], [0, 0, 1, 1], [], []>} : vector<8x128xbf16>, vector<128x384xbf16>, vector<8x384xf32> -> vector<8x384xf32>
    %c1 = arith.constant 1 : index
    %c0_53 = arith.constant 0 : index
    %70 = vector.load %arg8[%c1, %c0_53] : memref<3x384xf32, #tpu.memory_space<vmem>>, vector<1x384xf32>
    %71 = vector.broadcast %70 : vector<1x384xf32> to vector<8x384xf32>
    %72 = arith.addf %69, %71 : vector<8x384xf32>
    %73 = vector.extract_strided_slice %66 {offsets = [0, 0], sizes = [8, 128], strides = [1, 1]} : vector<8x384xf32> to vector<8x128xf32>
    %74 = vector.extract_strided_slice %72 {offsets = [0, 0], sizes = [8, 128], strides = [1, 1]} : vector<8x384xf32> to vector<8x128xf32>
    %75 = arith.addf %73, %74 : vector<8x128xf32>
    %76 = arith.negf %75 : vector<8x128xf32>
    %77 = math.exp %76 : vector<8x128xf32>
    %cst_54 = arith.constant 1.000000e+00 : f32
    %78 = vector.broadcast %cst_54 : f32 to vector<8x128xf32>
    %79 = arith.addf %78, %77 : vector<8x128xf32>
    %80 = arith.divf %78, %79 : vector<8x128xf32>
    %81 = vector.extract_strided_slice %66 {offsets = [0, 128], sizes = [8, 128], strides = [1, 1]} : vector<8x384xf32> to vector<8x128xf32>
    %82 = vector.extract_strided_slice %72 {offsets = [0, 128], sizes = [8, 128], strides = [1, 1]} : vector<8x384xf32> to vector<8x128xf32>
    %83 = arith.addf %81, %82 : vector<8x128xf32>
    %84 = arith.negf %83 : vector<8x128xf32>
    %85 = math.exp %84 : vector<8x128xf32>
    %cst_55 = arith.constant 1.000000e+00 : f32
    %86 = vector.broadcast %cst_55 : f32 to vector<8x128xf32>
    %87 = arith.addf %86, %85 : vector<8x128xf32>
    %88 = arith.divf %86, %87 : vector<8x128xf32>
    %89 = vector.extract_strided_slice %66 {offsets = [0, 256], sizes = [8, 128], strides = [1, 1]} : vector<8x384xf32> to vector<8x128xf32>
    %90 = vector.extract_strided_slice %72 {offsets = [0, 256], sizes = [8, 128], strides = [1, 1]} : vector<8x384xf32> to vector<8x128xf32>
    %91 = arith.mulf %80, %90 : vector<8x128xf32>
    %92 = arith.addf %89, %91 : vector<8x128xf32>
    %93 = math.tanh %92 : vector<8x128xf32>
    %cst_56 = arith.constant 1.000000e+00 : f32
    %94 = vector.broadcast %cst_56 : f32 to vector<8x128xf32>
    %95 = arith.subf %94, %88 : vector<8x128xf32>
    %96 = arith.mulf %95, %93 : vector<8x128xf32>
    %97 = arith.mulf %88, %60 : vector<8x128xf32>
    %98 = arith.addf %96, %97 : vector<8x128xf32>
    %c0_57 = arith.constant 0 : index
    %c0_58 = arith.constant 0 : index
    %c0_59 = arith.constant 0 : index
    %99 = vector.load %arg3[%c0_57, %c0_58, %c0_59] : memref<8x8x128xbf16, #tpu.memory_space<vmem>>, vector<8x8x128xbf16>
    %100 = arith.extf %99 : vector<8x8x128xbf16> to vector<8x8x128xf32>
    %101 = vector.shape_cast %98 : vector<8x128xf32> to vector<8x1x128xf32>
    %102 = vector.broadcast %101 : vector<8x1x128xf32> to vector<8x8x128xf32>
    %103 = arith.mulf %102, %100 : vector<8x8x128xf32>
    %cst_60 = arith.constant dense<0.000000e+00> : vector<8x8xf32>
    %104 = vector.multi_reduction <add>, %103, %cst_60 [2] : vector<8x8x128xf32> to vector<8x8xf32>
    %cst_61 = arith.constant dense<0xFF800000> : vector<8xf32>
    %105 = vector.multi_reduction <maximumf>, %104, %cst_61 [1] : vector<8x8xf32> to vector<8xf32>
    %106 = vector.shape_cast %105 : vector<8xf32> to vector<8x1xf32>
    %107 = vector.broadcast %106 : vector<8x1xf32> to vector<8x8xf32>
    %108 = arith.subf %104, %107 : vector<8x8xf32>
    %109 = math.exp %108 : vector<8x8xf32>
    %cst_62 = arith.constant dense<0.000000e+00> : vector<8xf32>
    %110 = vector.multi_reduction <add>, %109, %cst_62 [1] : vector<8x8xf32> to vector<8xf32>
    %111 = vector.shape_cast %110 : vector<8xf32> to vector<8x1xf32>
    %112 = vector.broadcast %111 : vector<8x1xf32> to vector<8x8xf32>
    %113 = arith.divf %109, %112 : vector<8x8xf32>
    %114 = vector.shape_cast %113 : vector<8x8xf32> to vector<8x8x1xf32>
    %115 = vector.broadcast %114 : vector<8x8x1xf32> to vector<8x8x128xf32>
    %116 = arith.mulf %115, %100 : vector<8x8x128xf32>
    %cst_63 = arith.constant dense<0.000000e+00> : vector<8x128xf32>
    %117 = vector.multi_reduction <add>, %116, %cst_63 [1] : vector<8x8x128xf32> to vector<8x128xf32>
    %118 = arith.truncf %98 : vector<8x128xf32> to vector<8x128xbf16>
    %c0_64 = arith.constant 0 : index
    %c0_65 = arith.constant 0 : index
    %119 = vector.load %arg6[%c0_64, %c0_65] : memref<256x128xbf16, #tpu.memory_space<vmem>>, vector<128x128xbf16>
    %cst_66 = arith.constant dense<0.000000e+00> : vector<8x128xf32>
    %120 = tpu.matmul %118, %119, %cst_66 {dimension_numbers = #tpu.dot_dimension_numbers<[1], [0], [0], [1], [0, 0, 1, 1], [], []>} : vector<8x128xbf16>, vector<128x128xbf16>, vector<8x128xf32> -> vector<8x128xf32>
    %121 = arith.truncf %117 : vector<8x128xf32> to vector<8x128xbf16>
    %c128 = arith.constant 128 : index
    %c0_67 = arith.constant 0 : index
    %122 = vector.load %arg6[%c128, %c0_67] : memref<256x128xbf16, #tpu.memory_space<vmem>>, vector<128x128xbf16>
    %cst_68 = arith.constant dense<0.000000e+00> : vector<8x128xf32>
    %123 = tpu.matmul %121, %122, %cst_68 {dimension_numbers = #tpu.dot_dimension_numbers<[1], [0], [0], [1], [0, 0, 1, 1], [], []>} : vector<8x128xbf16>, vector<128x128xbf16>, vector<8x128xf32> -> vector<8x128xf32>
    %124 = arith.addf %120, %123 : vector<8x128xf32>
    %c2 = arith.constant 2 : index
    %c0_69 = arith.constant 0 : index
    %125 = vector.load %arg8[%c2, %c0_69] : memref<3x384xf32, #tpu.memory_space<vmem>>, vector<1x128xf32>
    %126 = vector.broadcast %125 : vector<1x128xf32> to vector<8x128xf32>
    %127 = arith.addf %124, %126 : vector<8x128xf32>
    %128 = math.tanh %127 : vector<8x128xf32>
    %129 = arith.truncf %128 : vector<8x128xf32> to vector<8x128xbf16>
    %c0_70 = arith.constant 0 : index
    %c0_71 = arith.constant 0 : index
    %130 = vector.load %arg7[%c0_70, %c0_71] : memref<128x128xbf16, #tpu.memory_space<vmem>>, vector<128x128xbf16>
    %cst_72 = arith.constant dense<0.000000e+00> : vector<8x128xf32>
    %131 = tpu.matmul %129, %130, %cst_72 {dimension_numbers = #tpu.dot_dimension_numbers<[1], [0], [0], [1], [0, 0, 1, 1], [], []>} : vector<8x128xbf16>, vector<128x128xbf16>, vector<8x128xf32> -> vector<8x128xf32>
    %c0_73 = arith.constant 0 : index
    %c0_74 = arith.constant 0 : index
    %132 = vector.load %arg9[%c0_73, %c0_74] : memref<1x128xf32, #tpu.memory_space<vmem>>, vector<1x128xf32>
    %133 = vector.broadcast %132 : vector<1x128xf32> to vector<8x128xf32>
    %134 = arith.addf %131, %133 : vector<8x128xf32>
    %cst_75 = arith.constant dense<0xFF800000> : vector<8xf32>
    %135 = vector.multi_reduction <maximumf>, %134, %cst_75 [1] : vector<8x128xf32> to vector<8xf32>
    %136 = vector.shape_cast %135 : vector<8xf32> to vector<8x1xf32>
    %137 = vector.broadcast %136 : vector<8x1xf32> to vector<8x128xf32>
    %138 = arith.subf %134, %137 : vector<8x128xf32>
    %139 = math.exp %138 : vector<8x128xf32>
    %cst_76 = arith.constant dense<0.000000e+00> : vector<8xf32>
    %140 = vector.multi_reduction <add>, %139, %cst_76 [1] : vector<8x128xf32> to vector<8xf32>
    %141 = vector.shape_cast %140 : vector<8xf32> to vector<8x1xf32>
    %142 = vector.broadcast %141 : vector<8x1xf32> to vector<8x128xf32>
    %143 = arith.divf %139, %142 : vector<8x128xf32>
    %c0_77 = arith.constant 0 : index
    %c0_78 = arith.constant 0 : index
    %c0_79 = arith.constant 0 : index
    %144 = vector.load %arg11[%c0_77, %c0_78, %c0_79] : memref<1x8x128xf32, #tpu.memory_space<vmem>>, vector<1x8x128xf32>
    %145 = vector.shape_cast %144 : vector<1x8x128xf32> to vector<8x128xf32>
    %146 = vector.shape_cast %143 : vector<8x128xf32> to vector<1x8x128xf32>
    tpu.vector_store %arg11[%c0_77, %c0_78, %c0_79], %146 {strides = array<i32>} : memref<1x8x128xf32, #tpu.memory_space<vmem>>, vector<1x8x128xf32>,
    %c0_80 = arith.constant 0 : index
    %c0_81 = arith.constant 0 : index
    %147 = vector.load %arg13[%c0_80, %c0_81] : memref<8x128xf32, #tpu.memory_space<vmem>>, vector<8x128xf32>
    tpu.vector_store %arg13[%c0_80, %c0_81], %98 {strides = array<i32>} : memref<8x128xf32, #tpu.memory_space<vmem>>, vector<8x128xf32>,
    %c0_82 = arith.constant 0 : index
    %c0_83 = arith.constant 0 : index
    %148 = vector.load %arg12[%c0_82, %c0_83] : memref<8x128xf32, #tpu.memory_space<vmem>>, vector<8x128xf32>
    tpu.vector_store %arg12[%c0_82, %c0_83], %98 {strides = array<i32>} : memref<8x128xf32, #tpu.memory_space<vmem>>, vector<8x128xf32>,
    return
  }
  func.func @transform_0(%arg0: i32, %arg1: memref<1x8xi32, #tpu.memory_space<smem>>) -> (i32, i32) {
    %c0_i32 = arith.constant 0 : i32
    %c0_i32_0 = arith.constant 0 : i32
    %c0_i32_1 = arith.constant 0 : i32
    return %c0_i32, %c0_i32_0 : i32, i32
  }
  func.func @transform_1(%arg0: i32, %arg1: memref<1x8xi32, #tpu.memory_space<smem>>) -> (i32, i32, i32) {
    %c0_i32 = arith.constant 0 : i32
    %c0_i32_0 = arith.constant 0 : i32
    %c0_i32_1 = arith.constant 0 : i32
    %c0_i32_2 = arith.constant 0 : i32
    return %c0_i32, %c0_i32_0, %c0_i32_1 : i32, i32, i32
  }
  func.func @transform_2(%arg0: i32, %arg1: memref<1x8xi32, #tpu.memory_space<smem>>) -> (i32, i32) {
    %c0_i32 = arith.constant 0 : i32
    %c0_i32_0 = arith.constant 0 : i32
    %c0_i32_1 = arith.constant 0 : i32
    return %c0_i32, %c0_i32_0 : i32, i32
  }
  func.func @transform_3(%arg0: i32, %arg1: memref<1x8xi32, #tpu.memory_space<smem>>) -> (i32, i32) {
    %c0_i32 = arith.constant 0 : i32
    %c0_i32_0 = arith.constant 0 : i32
    %c0_i32_1 = arith.constant 0 : i32
    return %c0_i32, %c0_i32_0 : i32, i32
  }
  func.func @transform_4(%arg0: i32, %arg1: memref<1x8xi32, #tpu.memory_space<smem>>) -> (i32, i32) {
    %c0_i32 = arith.constant 0 : i32
    %c0_i32_0 = arith.constant 0 : i32
    %c0_i32_1 = arith.constant 0 : i32
    return %c0_i32, %c0_i32_0 : i32, i32
  }
  func.func @transform_5(%arg0: i32, %arg1: memref<1x8xi32, #tpu.memory_space<smem>>) -> (i32, i32) {
    %c0_i32 = arith.constant 0 : i32
    %c0_i32_0 = arith.constant 0 : i32
    %c0_i32_1 = arith.constant 0 : i32
    return %c0_i32, %c0_i32_0 : i32, i32
  }
  func.func @transform_6(%arg0: i32, %arg1: memref<1x8xi32, #tpu.memory_space<smem>>) -> (i32, i32) {
    %c0_i32 = arith.constant 0 : i32
    %c0_i32_0 = arith.constant 0 : i32
    %c0_i32_1 = arith.constant 0 : i32
    return %c0_i32, %c0_i32_0 : i32, i32
  }
  func.func @transform_7(%arg0: i32, %arg1: memref<1x8xi32, #tpu.memory_space<smem>>) -> (i32, i32) {
    %c0_i32 = arith.constant 0 : i32
    %c0_i32_0 = arith.constant 0 : i32
    %c0_i32_1 = arith.constant 0 : i32
    return %c0_i32, %c0_i32_0 : i32, i32
  }
  func.func @transform_9(%arg0: i32, %arg1: memref<1x8xi32, #tpu.memory_space<smem>>) -> (i32, i32, i32) {
    %c0_i32 = arith.constant 0 : i32
    %c0_i32_0 = arith.constant 0 : i32
    %c0_i32_1 = arith.constant 0 : i32
    return %arg0, %c0_i32, %c0_i32_0 : i32, i32, i32
  }
  func.func @transform_10(%arg0: i32, %arg1: memref<1x8xi32, #tpu.memory_space<smem>>) -> (i32, i32) {
    %c0_i32 = arith.constant 0 : i32
    %c0_i32_0 = arith.constant 0 : i32
    %c0_i32_1 = arith.constant 0 : i32
    return %c0_i32, %c0_i32_0 : i32, i32
  }
}

</mosaic_0001>

<bundles_post_ra>
// kernel: tpu_custom_call.1
= control target key start
LH: loop header
LB: loop body
LE: loop exit
PB: predicated region body
PF: predicated region fallthrough
CT: control target
= control target key end

     0   :  { %s2914_s17 = smov [#allocation6]   ;;  %s3405_s0 = inlined_call_operand.hbm [shape: s32[1,8], index: 0, kind: input, shape index: {}]   ;;  %s3406_s1 = inlined_call_operand.hbm [shape: f32[8,128], index: 1, kind: input, shape index: {}]   ;;  %s3407_s2 = inlined_call_operand.hbm [shape: bf16[8,8,128], index: 2, kind: input, shape index: {}]   ;;  %s3408_s3 = inlined_call_operand.hbm [shape: bf16[128,384], index: 3, kind: input, shape index: {}]   ;;  %s3409_s4 = inlined_call_operand.hbm [shape: bf16[128,384], index: 4, kind: input, shape index: {}]   ;;  %s3410_s5 = inlined_call_operand.hbm [shape: bf16[256,128], index: 5, kind: input, shape index: {}]   ;;  %s3411_s6 = inlined_call_operand.hbm [shape: bf16[128,128], index: 6, kind: input, shape index: {}]   ;;  %s3412_s7 = inlined_call_operand.vmem [shape: f32[3,384], index: 7, kind: input, shape index: {}]   ;;  %s3413_s8 = inlined_call_operand.vmem [shape: f32[1,128], index: 8, kind: input, shape index: {}]   ;;  %s3414_s9 = inlined_call_operand.hbm [shape: f32[64,128], index: 9, kind: input, shape index: {}]   ;;  %s3415_s10 = inlined_call_operand.hbm [shape: f32[1,8,128], index: 10, kind: output, shape index: {0}]   ;;  %s3416_s11 = inlined_call_operand.hbm [shape: f32[8,128], index: 11, kind: output, shape index: {1}]  }
   0x1   :  { %18 = dma.hbm_to_smem %s3405_s0, 16, %s2914_s17, [#allocation5] }
   0x2   :  { %2884 = dma.done.wait [#allocation5], 16 }
   0x3   :  { %2885 = vsyncadd [#allocation5], 4294967280 }
   0x4   :  { %20 = sfence }
   0x5   :  { %21 = vsyncpa [#allocation8], 0 }
   0x6   :  { %22 = vsyncpa [#allocation11], 0 }
   0x7   :  { %23 = vsyncpa [#allocation14], 0 }
   0x8   :  { %24 = vsyncpa [#allocation17], 0 }
   0x9   :  { %25 = vsyncpa [#allocation9], 0 }
   0xa   :  { %26 = vsyncpa [#allocation20], 0  ;;  %s2915_s20 = smov [#allocation10]  }
   0xb   :  { %s42_s21 = sshll.u32 %s2915_s20, 4  ;;  %s43_s21 = int_to_ptr.vmem [resolvable:$true] %s42_s21 }
   0xc   :  { %s2556_s22 = scalar_lea.vmem %s43_s21, 512  ;;  %p2561_p1 = scmp.lt.s32.totalorder %s43_s21, %s43_s21 }
   0xd   :  { %p2557_p0 = scmp.ne.s32.totalorder %s43_s21, %s2556_s22  ;;  %p2562_p2 = scmp.lt.s32.totalorder %s2556_s22, %s2556_s22 }
   0xf   :  { %p2563_p3 = por %p2562_p2, %p2561_p1 }
  0x11   :  { %p2564_p4 = pnand %p2563_p3, %p2557_p0 }
  0x13   :  { %2567 = shalt.err (!%p2564_p4)
}
  0x14   :  { %s2916_s0 = smov 64   ;;  %s2917_s23 = smov 4  }
  0x15   :  { %48 = dma.hbm_to_vmem [thread:$0]  %s3407_s2, 512, %s43_s21, [#allocation11], %s2916_s0, %s2916_s0, %s2917_s23  }
  0x16   :  { %s2918_s26 = smov [#allocation13]   ;;  %s2919_s28 = smov [#allocation7]  }
  0x17   :  { %s66_s27 = sshll.u32 %s2918_s26, 4  ;;  %s33_s29 = sshll.u32 %s2919_s28, 4  ;;  %s67_s27 = int_to_ptr.vmem [resolvable:$true] %s66_s27  ;;  %s34_s29 = int_to_ptr.vmem [resolvable:$true] %s33_s29 }
  0x18   :  { %s2576_s30 = scalar_lea.vmem %s67_s27, 3072  ;;  %p2581_p6 = scmp.lt.s32.totalorder %s67_s27, %s67_s27 }
  0x19   :  { %p2577_p5 = scmp.ne.s32.totalorder %s67_s27, %s2576_s30  ;;  %p2582_p7 = scmp.lt.s32.totalorder %s2576_s30, %s2576_s30 }
  0x1b   :  { %p2583_p8 = por %p2582_p7, %p2581_p6 }
  0x1d   :  { %p2584_p9 = pnand %p2583_p8, %p2577_p5 }
  0x1f   :  { %2587 = shalt.err (!%p2584_p9)
}
  0x20   :  { %s2920_s12 = smov 192   ;;  %s2921_s13 = smov 12  }
  0x21   :  { %72 = dma.hbm_to_vmem [thread:$0]  %s3409_s4, 3072, %s67_s27, [#allocation14], %s2920_s12, %s2920_s12, %s2921_s13  }
  0x22   :  { %s2596_s2 = scalar_lea.vmem %s34_s29, 128  ;;  %p2601_p11 = scmp.lt.s32.totalorder %s34_s29, %s34_s29 }
  0x23   :  { %p2597_p10 = scmp.ne.s32.totalorder %s34_s29, %s2596_s2  ;;  %p2602_p12 = scmp.lt.s32.totalorder %s2596_s2, %s2596_s2 }
  0x25   :  { %p2603_p13 = por %p2602_p12, %p2601_p11 }
  0x27   :  { %p2604_p0 = pnand %p2603_p13, %p2597_p10 }
  0x29   :  { %2607 = shalt.err (!%p2604_p0)
}
  0x2a   :  { %36 = dma.hbm_to_vmem [thread:$0]  %s3406_s1, 128, %s34_s29, [#allocation8]  }
  0x2b   :  { %s2922_s18 = smov [#allocation12]   ;;  %s2923_s20 = smov [#allocation15]  }
  0x2c   :  { %s54_s19 = sshll.u32 %s2922_s18, 4  ;;  %s78_s21 = sshll.u32 %s2923_s20, 4  ;;  %s55_s19 = int_to_ptr.vmem [resolvable:$true] %s54_s19  ;;  %s79_s21 = int_to_ptr.vmem [resolvable:$true] %s78_s21 }
  0x2d   :  { %s2616_s22 = scalar_lea.vmem %s55_s19, 3072  ;;  %p2621_p2 = scmp.lt.s32.totalorder %s55_s19, %s55_s19 }
  0x2e   :  { %p2617_p1 = scmp.ne.s32.totalorder %s55_s19, %s2616_s22  ;;  %p2622_p3 = scmp.lt.s32.totalorder %s2616_s22, %s2616_s22 }
  0x30   :  { %p2623_p4 = por %p2622_p3, %p2621_p2 }
  0x32   :  { %p2624_p5 = pnand %p2623_p4, %p2617_p1 }
  0x34   :  { %2627 = shalt.err (!%p2624_p5)
}
  0x35   :  { %60 = dma.hbm_to_vmem [thread:$0]  %s3408_s3, 3072, %s55_s19, [#allocation11], %s2920_s12, %s2920_s12, %s2921_s13  }
  0x36   :  { %s2636_s25 = scalar_lea.vmem %s79_s21, 2048  ;;  %p2641_p7 = scmp.lt.s32.totalorder %s79_s21, %s79_s21 }
  0x37   :  { %p2637_p6 = scmp.ne.s32.totalorder %s79_s21, %s2636_s25  ;;  %p2642_p8 = scmp.lt.s32.totalorder %s2636_s25, %s2636_s25 }
  0x39   :  { %p2643_p9 = por %p2642_p8, %p2641_p7 }
  0x3b   :  { %p2644_p10 = pnand %p2643_p9, %p2637_p6 }
  0x3d   :  { %2647 = shalt.err (!%p2644_p10)
}
  0x3e   :  { %84 = dma.hbm_to_vmem [thread:$0]  %s3410_s5, 2048, %s79_s21, [#allocation14], %s2916_s0, %s2916_s0, %s2917_s23  }
  0x3f   :  { %s2924_s27 = smov [#allocation16]  }
  0x40   :  { %s90_s28 = sshll.u32 %s2924_s27, 4  ;;  %s91_s28 = int_to_ptr.vmem [resolvable:$true] %s90_s28 }
  0x41   :  { %s2656_s29 = scalar_lea.vmem %s91_s28, 1024  ;;  %p2661_p12 = scmp.lt.s32.totalorder %s91_s28, %s91_s28 }
  0x42   :  { %p2657_p11 = scmp.ne.s32.totalorder %s91_s28, %s2656_s29  ;;  %p2662_p13 = scmp.lt.s32.totalorder %s2656_s29, %s2656_s29 }
  0x44   :  { %p2663_p0 = por %p2662_p13, %p2661_p12 }
  0x46   :  { %p2664_p1 = pnand %p2663_p0, %p2657_p11 }
  0x48   :  { %2667 = shalt.err (!%p2664_p1)
}
  0x49   :  { %96 = dma.hbm_to_vmem [thread:$0]  %s3411_s6, 1024, %s91_s28, [#allocation17], %s2916_s0, %s2916_s0, %s2917_s23  }
  0x4a   :  { %2886 = dma.done.wait [#allocation8], 128  }
  0x4b   :  { %2887 = vsyncadd [#allocation8], 4294967168 }
  0x4c   :  { %2888 = dma.done.wait [#allocation11], 3584  }
  0x4d   :  { %2889 = vsyncadd [#allocation11], 4294963712 }
  0x4e   :  { %2890 = dma.done.wait [#allocation14], 5120  }
  0x4f   :  { %2891 = vsyncadd [#allocation14], 4294962176 }
  0x50   :  { %2892 = dma.done.wait [#allocation17], 1024  }
  0x51   :  { %2893 = vsyncadd [#allocation17], 4294966272  ;;  %s126_s5 = sld [smem:[#allocation6]]  ;;  %s2925_s12 = smov [#allocation3]   ;;  %v3041_v0 = vld [vmem:[#allocation7] sm:$0xff] }
  0x52   :  { %s136_s13 = sshll.u32 %s2925_s12, 4  ;;  %s3031_s14 = sld [smem:[#allocation6 + $0x1]]  ;;  %s3029_s13 = int_to_ptr.vmem [resolvable:$true] %s136_s13 }
  0x53   :  { %s2926_s15 = smov [#allocation3 + $0x1]   ;;  %s3033_s16 = sld [smem:[#allocation6 + $0x2]] }
  0x54   :  { %s152_s2 = sshll.u32 %s2926_s15, 4  ;;  %s2927_s6 = smov [#allocation3 + $0x2]   ;;  %s3035_s2 = int_to_ptr.vmem [resolvable:$true] %s152_s2 }
  0x55   :  { %s168_s0 = sshll.u32 %s2927_s6, 4  ;;  %s3037_s23 = sld [smem:[#allocation6 + $0x3]]  ;;  %s3039_s0 = int_to_ptr.vmem [resolvable:$true] %s168_s0 }
  0x56   :  { %s2928_s18 = smov [#allocation3 + $0x3]   ;;  %s3052_s26 = scalar_lea.hbm %s3414_s9, 1024 }
  0x57   :  { %s2089_s17 = sshll.u32 %s126_s5, 4  ;;  %s3043_s19 = sshll.u32 %s2928_s18, 4  ;;  %s185_s19 = int_to_ptr.vmem [resolvable:$true] %s3043_s19 }
  0x58   :  { %s128_s22 = scalar_lea.hbm %s3414_s9, %s2089_s17  ;;  %s2091_s4 = sshll.u32 %s3031_s14, 4 }
  0x59   :  { %s2668_s24 = scalar_lea.hbm %s128_s22, 16  ;;  %p2671_p3 = scmp.lt.s32.totalorder %s128_s22, %s3414_s9 }
  0x5a   :  { %p2669_p2 = scmp.ne.s32.totalorder %s128_s22, %s2668_s24  ;;  %p2672_p4 = scmp.lt.s32.totalorder %s3052_s26, %s2668_s24 }
  0x5c   :  { %p2673_p5 = por %p2672_p4, %p2671_p3 }
  0x5e   :  { %p2674_p6 = pnand %p2673_p5, %p2669_p2 }
  0x60   :  { %2677 = shalt.err (!%p2674_p6)  }
  0x61   :  { %s2678_s29 = scalar_lea.vmem %s3029_s13, 16  ;;  %s3061_s3 = scalar_lea.vmem %s3029_s13, 256 }
  0x62   :  { %p2679_p7 = scmp.ne.s32.totalorder %s3029_s13, %s2678_s29  ;;  %p2683_p8 = scmp.lt.s32.totalorder %s3029_s13, %s3029_s13 }
  0x63   :  { %p2684_p9 = scmp.lt.s32.totalorder %s3061_s3, %s2678_s29 }
  0x65   :  { %p2685_p10 = por %p2684_p9, %p2683_p8 }
  0x67   :  { %p2686_p11 = pnand %p2685_p10, %p2679_p7 }
  0x69   :  { %2689 = shalt.err (!%p2686_p11)  }
  0x6a   :  { %139 = dma.hbm_to_vmem [thread:$0]  %s128_s22, 16, %s3029_s13, [#allocation4] }
  0x6b   :  { %s142_s12 = scalar_lea.hbm %s3414_s9, %s2091_s4  ;;  %s2093_s14 = sshll.u32 %s3033_s16, 4 }
  0x6c   :  { %s2690_s15 = scalar_lea.hbm %s142_s12, 16  ;;  %p2693_p13 = scmp.lt.s32.totalorder %s142_s12, %s3414_s9 }
  0x6d   :  { %p2691_p12 = scmp.ne.s32.totalorder %s142_s12, %s2690_s15  ;;  %p2694_p0 = scmp.lt.s32.totalorder %s3052_s26, %s2690_s15 }
  0x6f   :  { %p2695_p1 = por %p2694_p0, %p2693_p13 }
  0x71   :  { %p2696_p2 = pnand %p2695_p1, %p2691_p12 }
  0x73   :  { %2699 = shalt.err (!%p2696_p2)  }
  0x74   :  { %s2700_s18 = scalar_lea.vmem %s3035_s2, 16  ;;  %p2705_p4 = scmp.lt.s32.totalorder %s3035_s2, %s3029_s13 }
  0x75   :  { %p2701_p3 = scmp.ne.s32.totalorder %s3035_s2, %s2700_s18  ;;  %p2706_p5 = scmp.lt.s32.totalorder %s3061_s3, %s2700_s18 }
  0x77   :  { %p2707_p6 = por %p2706_p5, %p2705_p4 }
  0x79   :  { %p2708_p7 = pnand %p2707_p6, %p2701_p3 }
  0x7b   :  { %2711 = shalt.err (!%p2708_p7)  }
  0x7c   :  { %155 = dma.hbm_to_vmem [thread:$0]  %s142_s12, 16, %s3035_s2, [#allocation4 + $0x1] }
  0x7d   :  { %s158_s21 = scalar_lea.hbm %s3414_s9, %s2093_s14  ;;  %s2095_s22 = sshll.u32 %s3037_s23, 4 }
  0x7e   :  { %s2712_s4 = scalar_lea.hbm %s158_s21, 16  ;;  %p2715_p9 = scmp.lt.s32.totalorder %s158_s21, %s3414_s9 }
  0x7f   :  { %p2713_p8 = scmp.ne.s32.totalorder %s158_s21, %s2712_s4  ;;  %p2716_p10 = scmp.lt.s32.totalorder %s3052_s26, %s2712_s4 }
  0x81   :  { %p2717_p11 = por %p2716_p10, %p2715_p9 }
  0x83   :  { %p2718_p12 = pnand %p2717_p11, %p2713_p8 }
  0x85   :  { %2721 = shalt.err (!%p2718_p12)  }
  0x86   :  { %s2722_s2 = scalar_lea.vmem %s3039_s0, 16  ;;  %p2727_p0 = scmp.lt.s32.totalorder %s3039_s0, %s3029_s13 }
  0x87   :  { %p2723_p13 = scmp.ne.s32.totalorder %s3039_s0, %s2722_s2  ;;  %p2728_p1 = scmp.lt.s32.totalorder %s3061_s3, %s2722_s2 }
  0x89   :  { %p2729_p2 = por %p2728_p1, %p2727_p0 }
  0x8b   :  { %p2730_p3 = pnand %p2729_p2, %p2723_p13 }
  0x8d   :  { %2733 = shalt.err (!%p2730_p3)  }
  0x8e   :  { %171 = dma.hbm_to_vmem [thread:$0]  %s158_s21, 16, %s3039_s0, [#allocation4 + $0x2] }
  0x8f   :  { %s174_s27 = scalar_lea.hbm %s3414_s9, %s2095_s22 }
  0x90   :  { %s2734_s28 = scalar_lea.hbm %s174_s27, 16  ;;  %p2737_p5 = scmp.lt.s32.totalorder %s174_s27, %s3414_s9 }
  0x91   :  { %p2735_p4 = scmp.ne.s32.totalorder %s174_s27, %s2734_s28  ;;  %p2738_p6 = scmp.lt.s32.totalorder %s3052_s26, %s2734_s28 }
  0x93   :  { %p2739_p7 = por %p2738_p6, %p2737_p5 }
  0x95   :  { %p2740_p8 = pnand %p2739_p7, %p2735_p4 }
  0x97   :  { %2743 = shalt.err (!%p2740_p8)  }
  0x98   :  { %s2744_s5 = scalar_lea.vmem %s185_s19, 16  ;;  %p2749_p10 = scmp.lt.s32.totalorder %s185_s19, %s3029_s13 }
  0x99   :  { %p2745_p9 = scmp.ne.s32.totalorder %s185_s19, %s2744_s5  ;;  %p2750_p11 = scmp.lt.s32.totalorder %s3061_s3, %s2744_s5 }
  0x9b   :  { %p2751_p12 = por %p2750_p11, %p2749_p10 }
  0x9d   :  { %p2752_p13 = pnand %p2751_p12, %p2745_p9 }
  0x9f   :  { %2755 = shalt.err (!%p2752_p13)  }
  0xa0   :  { %187 = dma.hbm_to_vmem [thread:$0]  %s174_s27, 16, %s185_s19, [#allocation4 + $0x3] }
  0xa1   :  { %s2096_s0 = sld [smem:[#allocation6 + $0x4]]  ;;  %s2929_s12 = smov [#allocation3 + $0x4]  }
  0xa2   :  { %s200_s14 = sshll.u32 %s2929_s12, 4  ;;  %s3105_s15 = sld [smem:[#allocation6 + $0x5]]  ;;  %s201_s14 = int_to_ptr.vmem [resolvable:$true] %s200_s14 }
  0xa3   :  { %s2930_s6 = smov [#allocation3 + $0x5]   ;;  %s3107_s18 = sld [smem:[#allocation6 + $0x6]] }
  0xa4   :  { %s216_s17 = sshll.u32 %s2930_s6, 4  ;;  %s2931_s16 = smov [#allocation3 + $0x6]   ;;  %s3109_s17 = int_to_ptr.vmem [resolvable:$true] %s216_s17 }
  0xa5   :  { %s232_s20 = sshll.u32 %s2931_s16, 4  ;;  %s3111_s21 = sld [smem:[#allocation6 + $0x7]]  ;;  %s3113_s20 = int_to_ptr.vmem [resolvable:$true] %s232_s20 }
  0xa7   :  { %s2097_s22 = sshll.u32 %s2096_s0, 4 }
  0xa8   :  { %s190_s24 = scalar_lea.hbm %s3414_s9, %s2097_s22  ;;  %s2099_s25 = sshll.u32 %s3105_s15, 4 }
  0xa9   :  { %s2756_s2 = scalar_lea.hbm %s190_s24, 16  ;;  %p2759_p1 = scmp.lt.s32.totalorder %s190_s24, %s3414_s9 }
  0xaa   :  { %p2757_p0 = scmp.ne.s32.totalorder %s190_s24, %s2756_s2  ;;  %p2760_p2 = scmp.lt.s32.totalorder %s3052_s26, %s2756_s2 }
  0xac   :  { %p2761_p3 = por %p2760_p2, %p2759_p1 }
  0xae   :  { %p2762_p4 = pnand %p2761_p3, %p2757_p0 }
  0xb0   :  { %2765 = shalt.err (!%p2762_p4)  }
  0xb1   :  { %s2766_s27 = scalar_lea.vmem %s201_s14, 16  ;;  %p2771_p6 = scmp.lt.s32.totalorder %s201_s14, %s3029_s13 }
  0xb2   :  { %p2767_p5 = scmp.ne.s32.totalorder %s201_s14, %s2766_s27  ;;  %p2772_p7 = scmp.lt.s32.totalorder %s3061_s3, %s2766_s27 }
  0xb4   :  { %p2773_p8 = por %p2772_p7, %p2771_p6 }
  0xb6   :  { %p2774_p9 = pnand %p2773_p8, %p2767_p5 }
  0xb8   :  { %2777 = shalt.err (!%p2774_p9)  }
  0xb9   :  { %203 = dma.hbm_to_vmem [thread:$0]  %s190_s24, 16, %s201_s14, [#allocation4 + $0x4] }
  0xba   :  { %s206_s30 = scalar_lea.hbm %s3414_s9, %s2099_s25  ;;  %s2101_s5 = sshll.u32 %s3107_s18, 4 }
  0xbb   :  { %s2778_s0 = scalar_lea.hbm %s206_s30, 16  ;;  %p2781_p11 = scmp.lt.s32.totalorder %s206_s30, %s3414_s9 }
  0xbc   :  { %p2779_p10 = scmp.ne.s32.totalorder %s206_s30, %s2778_s0  ;;  %p2782_p12 = scmp.lt.s32.totalorder %s3052_s26, %s2778_s0 }
  0xbe   :  { %p2783_p13 = por %p2782_p12, %p2781_p11 }
  0xc0   :  { %p2784_p0 = pnand %p2783_p13, %p2779_p10 }
  0xc2   :  { %2787 = shalt.err (!%p2784_p0)  }
  0xc3   :  { %s2788_s14 = scalar_lea.vmem %s3109_s17, 16  ;;  %p2793_p2 = scmp.lt.s32.totalorder %s3109_s17, %s3029_s13 }
  0xc4   :  { %p2789_p1 = scmp.ne.s32.totalorder %s3109_s17, %s2788_s14  ;;  %p2794_p3 = scmp.lt.s32.totalorder %s3061_s3, %s2788_s14 }
  0xc6   :  { %p2795_p4 = por %p2794_p3, %p2793_p2 }
  0xc8   :  { %p2796_p5 = pnand %p2795_p4, %p2789_p1 }
  0xca   :  { %2799 = shalt.err (!%p2796_p5)  }
  0xcb   :  { %219 = dma.hbm_to_vmem [thread:$0]  %s206_s30, 16, %s3109_s17, [#allocation4 + $0x5] }
  0xcc   :  { %s222_s16 = scalar_lea.hbm %s3414_s9, %s2101_s5  ;;  %s2103_s22 = sshll.u32 %s3111_s21, 4 }
  0xcd   :  { %s2800_s19 = scalar_lea.hbm %s222_s16, 16  ;;  %p2803_p7 = scmp.lt.s32.totalorder %s222_s16, %s3414_s9 }
  0xce   :  { %p2801_p6 = scmp.ne.s32.totalorder %s222_s16, %s2800_s19  ;;  %p2804_p8 = scmp.lt.s32.totalorder %s3052_s26, %s2800_s19 }
  0xd0   :  { %p2805_p9 = por %p2804_p8, %p2803_p7 }
  0xd2   :  { %p2806_p10 = pnand %p2805_p9, %p2801_p6 }
  0xd4   :  { %2809 = shalt.err (!%p2806_p10)  }
  0xd5   :  { %s2810_s17 = scalar_lea.vmem %s3113_s20, 16  ;;  %p2815_p12 = scmp.lt.s32.totalorder %s3113_s20, %s3029_s13 }
  0xd6   :  { %p2811_p11 = scmp.ne.s32.totalorder %s3113_s20, %s2810_s17  ;;  %p2816_p13 = scmp.lt.s32.totalorder %s3061_s3, %s2810_s17 }
  0xd8   :  { %p2817_p0 = por %p2816_p13, %p2815_p12 }
  0xda   :  { %p2818_p1 = pnand %p2817_p0, %p2811_p11 }
  0xdc   :  { %2821 = shalt.err (!%p2818_p1)  }
  0xdd   :  { %235 = dma.hbm_to_vmem [thread:$0]  %s222_s16, 16, %s3113_s20, [#allocation4 + $0x6] }
  0xde   :  { %s238_s2 = scalar_lea.hbm %s3414_s9, %s2103_s22  ;;  %s2932_s23 = smov [#allocation3 + $0x7]  }
  0xdf   :  { %s248_s1 = sshll.u32 %s2932_s23, 4  ;;  %s2822_s27 = scalar_lea.hbm %s238_s2, 16  ;;  %s249_s1 = int_to_ptr.vmem [resolvable:$true] %s248_s1 }
  0xe0   :  { %p2823_p2 = scmp.ne.s32.totalorder %s238_s2, %s2822_s27  ;;  %p2825_p3 = scmp.lt.s32.totalorder %s238_s2, %s3414_s9 }
  0xe1   :  { %p2826_p4 = scmp.lt.s32.totalorder %s3052_s26, %s2822_s27 }
  0xe3   :  { %p2827_p5 = por %p2826_p4, %p2825_p3 }
  0xe5   :  { %p2828_p6 = pnand %p2827_p5, %p2823_p2 }
  0xe7   :  { %2831 = shalt.err (!%p2828_p6)  }
  0xe8   :  { %s2832_s30 = scalar_lea.vmem %s249_s1, 16  ;;  %p2837_p8 = scmp.lt.s32.totalorder %s249_s1, %s3029_s13 }
  0xe9   :  { %p2833_p7 = scmp.ne.s32.totalorder %s249_s1, %s2832_s30  ;;  %p2838_p9 = scmp.lt.s32.totalorder %s3061_s3, %s2832_s30 }
  0xeb   :  { %p2839_p10 = por %p2838_p9, %p2837_p8 }
  0xed   :  { %p2840_p11 = pnand %p2839_p10, %p2833_p7 }
  0xef   :  { %2843 = shalt.err (!%p2840_p11)  }
  0xf0   :  { %251 = dma.hbm_to_vmem [thread:$0]  %s238_s2, 16, %s249_s1, [#allocation4 + $0x7] }
  0xf1   :  { %2894 = dma.done.wait [#allocation4], 16 }
  0xf2   :  { %2895 = vsyncadd [#allocation4], 4294967280 }
  0xf3   :  { %2896 = dma.done.wait [#allocation4 + $0x1], 16 }
  0xf4   :  { %2897 = vsyncadd [#allocation4 + $0x1], 4294967280 }
  0xf5   :  { %2898 = dma.done.wait [#allocation4 + $0x2], 16 }
  0xf6   :  { %2899 = vsyncadd [#allocation4 + $0x2], 4294967280 }
  0xf7   :  { %2900 = dma.done.wait [#allocation4 + $0x3], 16 }
  0xf8   :  { %2901 = vsyncadd [#allocation4 + $0x3], 4294967280 }
  0xf9   :  { %2902 = dma.done.wait [#allocation4 + $0x4], 16 }
  0xfa   :  { %2903 = vsyncadd [#allocation4 + $0x4], 4294967280 }
  0xfb   :  { %2904 = dma.done.wait [#allocation4 + $0x5], 16 }
  0xfc   :  { %2905 = vsyncadd [#allocation4 + $0x5], 4294967280 }
  0xfd   :  { %2906 = dma.done.wait [#allocation4 + $0x6], 16 }
  0xfe   :  { %2907 = vsyncadd [#allocation4 + $0x6], 4294967280 }
  0xff   :  { %2908 = dma.done.wait [#allocation4 + $0x7], 16 }
 0x100   :  { %2909 = vsyncadd [#allocation4 + $0x7], 4294967280  ;;  %v2933_v1 = vmov 0.0   ;;  %v2934_v2 = vmov 0   ;;  %vm2935_vm0 = vmmov 0   ;;  %v444_v24 = vld [vmem:[#allocation3] sm:$0xff]  ;;  %v705_v51 = vpack.c.bf16 %v3041_v0, %v3041_v0 }
 0x101   :  { %2277 = vmatprep.subr.bf16.mxu1 %v2933_v1  ;;  %656 = vmatprep.mubr.bf16.mxu0 %v2934_v2  ;;  %v2404_v3 = vld [vmem:[#allocation12 + $0xac] ss:$12 sps:$4 sm:$0xff]   ;;  %v2406_v4 = vld [vmem:[#allocation12 + $0xa8] ss:$12 sps:$4 sm:$0xff]   ;;  %v2409_v6 = vld [vmem:[#allocation12 + $0x90] ss:$12 sps:$4 sm:$0xff]   ;;  %v446_v27 = vpack.c.bf16 %v444_v24, %v444_v24 }
 0x102   :  { %2293 = vmatprep.mubr.msk.bf16.mxu1 %vm2935_vm0, %v2933_v1  ;;  %2403 = vset.pattern.permute.xlu0 %v2934_v2  ;;  %v2407_v5 = vld [vmem:[#allocation12 + $0x94] ss:$12 sps:$4 sm:$0xff]   ;;  %v2410_v7 = vld [vmem:[#allocation12 + $0x7c] ss:$12 sps:$4 sm:$0xff]   ;;  %v2412_v8 = vld [vmem:[#allocation12 + $0x78] ss:$12 sps:$4 sm:$0xff]  }
 0x103   :  { %2402 = vset.pattern.permute.xlu1 %v2934_v2  ;;  %624 = vmatprep.subr.bf16.mxu0 %v2404_v3  ;;  %v2413_v9 = vld [vmem:[#allocation12 + $0x64] ss:$12 sps:$4 sm:$0xff]   ;;  %v2415_v10 = vld [vmem:[#allocation12 + $0x60] ss:$12 sps:$4 sm:$0xff]   ;;  %v2418_v14 = vld [vmem:[#allocation12 + $0x48] ss:$12 sps:$4 sm:$0xff]  }
 0x104   :  { %625 = vmatpush1.bf16.msra.mxu0 %v2406_v4  ;;  %v2428_v11 = vld [vmem:[#allocation12 + $0xb0] ss:$12 sps:$4 sm:$0xff]   ;;  %v2416_v12 = vld [vmem:[#allocation12 + $0x4c] ss:$12 sps:$4 sm:$0xff]   ;;  %v2419_v15 = vld [vmem:[#allocation12 + $0x34] ss:$12 sps:$4 sm:$0xff]  }
 0x105   :  { %626 = vmatprep.subr.bf16.mxu0 %v2407_v5  ;;  %2278 = vmatpush3.bf16.msra.mxu1 %v2428_v11  ;;  %v2432_v13 = vld [vmem:[#allocation12 + $0x98] ss:$12 sps:$4 sm:$0xff]   ;;  %v2436_v16 = vld [vmem:[#allocation12 + $0x80] ss:$12 sps:$4 sm:$0xff]   ;;  %v2421_v17 = vld [vmem:[#allocation12 + $0x30] ss:$12 sps:$4 sm:$0xff]  }
 0x106   :  { %2279 = vmatprep.subr.bf16.mxu1 %v2933_v1  ;;  %v2422_v18 = vld [vmem:[#allocation12 + $0x1c] ss:$12 sps:$4 sm:$0xff]   ;;  %v2424_v20 = vld [vmem:[#allocation12 + $0x18] ss:$12 sps:$4 sm:$0xff]   ;;  %v2427_v23 = vld [vmem:[#allocation12] ss:$12 sps:$4 sm:$0xff]  }
 0x107   :  { %v2440_v19 = vld [vmem:[#allocation12 + $0x68] ss:$12 sps:$4 sm:$0xff]   ;;  %v2425_v21 = vld [vmem:[#allocation12 + $0x4] ss:$12 sps:$4 sm:$0xff]   ;;  %v2431_v25 = vld [vmem:[#allocation13 + $0xac] ss:$12 sps:$4 sm:$0xff]  }
 0x108   :  { %627 = vmatpush1.bf16.msra.mxu0 %v2409_v6  ;;  %v2444_v22 = vld [vmem:[#allocation12 + $0x50] ss:$12 sps:$4 sm:$0xff]   ;;  %v2448_v26 = vld [vmem:[#allocation12 + $0x38] ss:$12 sps:$4 sm:$0xff]   ;;  %v2429_v28 = vld [vmem:[#allocation13 + $0xa8] ss:$12 sps:$4 sm:$0xff]  }
 0x109   :  { %628 = vmatprep.subr.bf16.mxu0 %v2410_v7  ;;  %2280 = vmatpush3.bf16.msra.mxu1 %v2432_v13  ;;  %v2435_v29 = vld [vmem:[#allocation13 + $0x94] ss:$12 sps:$4 sm:$0xff]   ;;  %v2433_v31 = vld [vmem:[#allocation13 + $0x90] ss:$12 sps:$4 sm:$0xff]   ;;  %v2437_v34 = vld [vmem:[#allocation13 + $0x78] ss:$12 sps:$4 sm:$0xff]  }
 0x10a   :  { %2281 = vmatprep.subr.bf16.mxu1 %v2933_v1  ;;  %v2452_v30 = vld [vmem:[#allocation12 + $0x20] ss:$12 sps:$4 sm:$0xff]   ;;  %v2439_v32 = vld [vmem:[#allocation13 + $0x7c] ss:$12 sps:$4 sm:$0xff]   ;;  %v2443_v35 = vld [vmem:[#allocation13 + $0x64] ss:$12 sps:$4 sm:$0xff]  }
 0x10b   :  { %v2456_v33 = vld [vmem:[#allocation12 + $0x8] ss:$12 sps:$4 sm:$0xff]   ;;  %v2460_v36 = vld [vmem:[#allocation13 + $0xb0] ss:$12 sps:$4 sm:$0xff]   ;;  %v2441_v37 = vld [vmem:[#allocation13 + $0x60] ss:$12 sps:$4 sm:$0xff]  }
 0x10c   :  { %629 = vmatpush1.bf16.msra.mxu0 %v2412_v8  ;;  %v2447_v38 = vld [vmem:[#allocation13 + $0x4c] ss:$12 sps:$4 sm:$0xff]   ;;  %v2445_v40 = vld [vmem:[#allocation13 + $0x48] ss:$12 sps:$4 sm:$0xff]   ;;  %v2449_v43 = vld [vmem:[#allocation13 + $0x30] ss:$12 sps:$4 sm:$0xff]   ;;  %v481_v8 = vlaneseq }
 0x10d   :  { %630 = vmatprep.subr.bf16.mxu0 %v2413_v9  ;;  %2282 = vmatpush3.bf16.msra.mxu1 %v2436_v16  ;;  %v2461_v39 = vld [vmem:[#allocation13 + $0x98] ss:$12 sps:$4 sm:$0xff]   ;;  %v2451_v41 = vld [vmem:[#allocation13 + $0x34] ss:$12 sps:$4 sm:$0xff]   ;;  %v2455_v44 = vld [vmem:[#allocation13 + $0x1c] ss:$12 sps:$4 sm:$0xff]  }
 0x10e   :  { %2283 = vmatprep.subr.bf16.mxu1 %v2933_v1  ;;  %v2462_v42 = vld [vmem:[#allocation13 + $0x80] ss:$12 sps:$4 sm:$0xff]   ;;  %v2463_v45 = vld [vmem:[#allocation13 + $0x68] ss:$12 sps:$4 sm:$0xff]   ;;  %v2453_v46 = vld [vmem:[#allocation13 + $0x18] ss:$12 sps:$4 sm:$0xff]  }
 0x10f   :  { %v2459_v47 = vld [vmem:[#allocation13 + $0x4] ss:$12 sps:$4 sm:$0xff]   ;;  %v2457_v49 = vld [vmem:[#allocation13] ss:$12 sps:$4 sm:$0xff]   ;;  %v2467_v53 = vld [vmem:[#allocation13 + $0x8] ss:$12 sps:$4 sm:$0xff]  }
 0x110   :  { %631 = vmatpush1.bf16.msra.mxu0 %v2415_v10  ;;  %v2464_v48 = vld [vmem:[#allocation13 + $0x50] ss:$12 sps:$4 sm:$0xff]   ;;  %v2465_v50 = vld [vmem:[#allocation13 + $0x38] ss:$12 sps:$4 sm:$0xff]   ;;  %v2466_v52 = vld [vmem:[#allocation13 + $0x20] ss:$12 sps:$4 sm:$0xff]  }
 0x111   :  { %632 = vmatprep.subr.bf16.mxu0 %v2416_v12  ;;  %2284 = vmatpush3.bf16.msra.mxu1 %v2440_v19  ;;  %v2468_v54 = vld [vmem:[#allocation15 + $0x38] sm:$0xff]   ;;  %v2469_v55 = vld [vmem:[#allocation15 + $0x30] sm:$0xff]   ;;  %v2470_v56 = vld [vmem:[#allocation15 + $0x28] sm:$0xff]   ;;  %v3202_v9 = vshrl.u32 %v481_v8, 7  ;;  %vm1158_vm1 = vcmask 1041409   ;;  %vm1160_vm2 = vcmask 1042434  }
 0x112   :  { %2285 = vmatprep.subr.bf16.mxu1 %v2933_v1  ;;  %v2471_v57 = vld [vmem:[#allocation15 + $0x20] sm:$0xff]   ;;  %v2472_v58 = vld [vmem:[#allocation15 + $0x18] sm:$0xff]   ;;  %v2473_v59 = vld [vmem:[#allocation15 + $0x10] sm:$0xff]   ;;  %vm1162_vm3 = vcmask 1043459   ;;  %vm1164_vm4 = vcmask 1044484   ;;  %vm1166_vm5 = vcmask 1045509  }
 0x113   :  { %v2474_v60 = vld [vmem:[#allocation15 + $0x8] sm:$0xff]   ;;  %v2475_v61 = vld [vmem:[#allocation15] sm:$0xff]   ;;  %v3205_v10 = vsub.s32 0, %v3202_v9  ;;  %vm1168_vm6 = vcmask 1046534   ;;  %vm1170_vm7 = vcmask 1047559   ;;  %vm1173_vm8 = vcmask 64512  }
 0x114   :  { %633 = vmatpush1.bf16.msra.mxu0 %v2418_v14  ;;  %v479_v11 = vld [vmem:[%s3412_s7] ss:$4 sm:$0x7]  ;;  %v2144_v12 = vld [vmem:[%s3412_s7 + $0x1] ss:$4 sm:$0x7] }
 0x115   :  { %634 = vmatprep.subr.bf16.mxu0 %v2419_v15  ;;  %2286 = vmatpush3.bf16.msra.mxu1 %v2444_v22  ;;  %v484_v13 = vrot.slane %v479_v11, %v3205_v10  ;;  %v744_v14 = vrot.slane %v2144_v12, %v3205_v10  ;;  %v3216_v15 = vsub.s32 1, %v3202_v9 }
 0x116   :  { %2287 = vmatprep.subr.bf16.mxu1 %v2933_v1 }
 0x117   :  { %v748_v19 = vrot.slane %v2144_v12, %v3216_v15 }
 0x118   :  { %635 = vmatpush1.bf16.msra.mxu0 %v2421_v17 }
 0x119   :  { %636 = vmatprep.subr.bf16.mxu0 %v2422_v18  ;;  %2288 = vmatpush3.bf16.msra.mxu1 %v2448_v26 }
 0x11a   :  { %2289 = vmatprep.subr.bf16.mxu1 %v2933_v1 }
 0x11c   :  { %637 = vmatpush1.bf16.msra.mxu0 %v2424_v20 }
 0x11d   :  { %638 = vmatprep.subr.bf16.mxu0 %v2425_v21  ;;  %2290 = vmatpush3.bf16.msra.mxu1 %v2452_v30  ;;  %v488_v21 = vrot.slane %v479_v11, %v3216_v15 }
 0x11e   :  { %2291 = vmatprep.subr.bf16.mxu1 %v2933_v1 }
 0x120   :  { %639 = vmatpush1.bf16.msra.mxu0 %v2427_v23 }
 0x121   :  { %884 = vmatprep.subr.bf16.mxu0 %v2431_v25  ;;  %2292 = vmatpush3.bf16.msra.mxu1 %v2456_v33 }
 0x122   :  { %2297 = vmatprep.subr.bf16.mxu1 %v2933_v1 }
 0x123   :  { %657 = vmatmul.mubr.bf16.vlgmr.msra.gmra.mxu0 %v446_v27 }
 0x124   :  { %885 = vmatpush1.bf16.msra.mxu0 %v2429_v28  ;;  %916 = vmatprep.mubr.bf16.mxu0 %v2934_v2 }
 0x125   :  { %886 = vmatprep.subr.bf16.mxu0 %v2435_v29  ;;  %2294 = vmatmul.mubr.bf16.vlgmr.msra.gmra.mxu1 %v446_v27 }
 0x126   :  { %2298 = vmatpush3.bf16.msra.mxu1 %v2460_v36  ;;  %2313 = vmatprep.mubr.msk.bf16.mxu1 %vm2935_vm0, %v2933_v1  ;;  %v3221_v36 = vsub.s32 2, %v3202_v9 }
 0x127   :  { %2299 = vmatprep.subr.bf16.mxu1 %v2933_v1 }
 0x128   :  { %887 = vmatpush1.bf16.msra.mxu0 %v2433_v31 }
 0x129   :  { %888 = vmatprep.subr.bf16.mxu0 %v2439_v32 }
 0x12a   :  { %2300 = vmatpush3.bf16.msra.mxu1 %v2461_v39  ;;  %v492_v39 = vrot.slane %v479_v11, %v3221_v36 }
 0x12b   :  { %2301 = vmatprep.subr.bf16.mxu1 %v2933_v1 }
 0x12c   :  { %889 = vmatpush1.bf16.msra.mxu0 %v2437_v34 }
 0x12d   :  { %890 = vmatprep.subr.bf16.mxu0 %v2443_v35 }
 0x12e   :  { %2302 = vmatpush3.bf16.msra.mxu1 %v2462_v42 }
 0x12f   :  { %2303 = vmatprep.subr.bf16.mxu1 %v2933_v1 }
 0x130   :  { %891 = vmatpush1.bf16.msra.mxu0 %v2441_v37  ;;  %v752_v37 = vrot.slane %v2144_v12, %v3221_v36 }
 0x131   :  { %892 = vmatprep.subr.bf16.mxu0 %v2447_v38 }
 0x132   :  { %2304 = vmatpush3.bf16.msra.mxu1 %v2463_v45 }
 0x133   :  { %2305 = vmatprep.subr.bf16.mxu1 %v2933_v1 }
 0x134   :  { %893 = vmatpush1.bf16.msra.mxu0 %v2445_v40 }
 0x135   :  { %894 = vmatprep.subr.bf16.mxu0 %v2451_v41 }
 0x136   :  { %2306 = vmatpush3.bf16.msra.mxu1 %v2464_v48 }
 0x137   :  { %2307 = vmatprep.subr.bf16.mxu1 %v2933_v1 }
 0x138   :  { %895 = vmatpush1.bf16.msra.mxu0 %v2449_v43 }
 0x139   :  { %896 = vmatprep.subr.bf16.mxu0 %v2455_v44 }
 0x13a   :  { %2308 = vmatpush3.bf16.msra.mxu1 %v2465_v50 }
 0x13b   :  { %2309 = vmatprep.subr.bf16.mxu1 %v2933_v1 }
 0x13c   :  { %897 = vmatpush1.bf16.msra.mxu0 %v2453_v46  ;;  %v2936_v46 = vmov 1966171168  }
 0x13d   :  { %898 = vmatprep.subr.bf16.mxu0 %v2459_v47  ;;  %v1005_v47 = vunpack.c.l.s4 %v2936_v46 }
 0x13e   :  { %2310 = vmatpush3.bf16.msra.mxu1 %v2466_v52 }
 0x13f   :  { %2311 = vmatprep.subr.bf16.mxu1 %v2933_v1 }
 0x140   :  { %899 = vmatpush1.bf16.msra.mxu0 %v2457_v49  ;;  %v1006_v49 = vunpack.c.0.s8 %v1005_v47 }
 0x141   :  { %2317 = vmatprep.subr.bf16.mxu0 %v2933_v1 }
 0x142   :  { %2312 = vmatpush3.bf16.msra.mxu1 %v2467_v53 }
 0x143   :  { %917 = vmatmul.mubr.bf16.vlgmr.msra.gmra.mxu0 %v705_v51  ;;  %2337 = vmatprep.subr.bf16.mxu1 %v2933_v1 }
 0x144   :  { %2333 = vmatprep.mubr.msk.bf16.mxu0 %vm2935_vm0, %v2933_v1 }
 0x145   :  { %2314 = vmatmul.mubr.bf16.vlgmr.msra.gmra.mxu1 %v705_v51 }
 0x146   :  { %2353 = vmatprep.mubr.msk.bf16.mxu1 %vm2935_vm0, %v2933_v1  ;;  %2338 = vmatpush3.bf16.msra.mxu1 %v2468_v54  ;;  %v1009_v54 = vsub.s32 %v1006_v49, %v3202_v9 }
 0x147   :  { %2339 = vmatprep.subr.bf16.mxu1 %v2933_v1 }
 0x14a   :  { %2340 = vmatpush3.bf16.msra.mxu1 %v2469_v55 }
 0x14b   :  { %2341 = vmatprep.subr.bf16.mxu1 %v2933_v1 }
 0x14e   :  { %2342 = vmatpush3.bf16.msra.mxu1 %v2470_v56  ;;  %v3227_v56 = vld [vmem:[#allocation10] sm:$0xff]  }
 0x14f   :  { %2343 = vmatprep.subr.bf16.mxu1 %v2933_v1 }
 0x152   :  { %2344 = vmatpush3.bf16.msra.mxu1 %v2471_v57 }
 0x153   :  { %2345 = vmatprep.subr.bf16.mxu1 %v2933_v1 }
 0x156   :  { %2346 = vmatpush3.bf16.msra.mxu1 %v2472_v58 }
 0x157   :  { %2347 = vmatprep.subr.bf16.mxu1 %v2933_v1 }
 0x15a   :  { %2348 = vmatpush3.bf16.msra.mxu1 %v2473_v59 }
 0x15b   :  { %2349 = vmatprep.subr.bf16.mxu1 %v2933_v1 }
 0x15e   :  { %2350 = vmatpush3.bf16.msra.mxu1 %v2474_v60  ;;  %v3229_v60 = vld [vmem:[#allocation10 + $0x8] sm:$0xff]  }
 0x15f   :  { %2351 = vmatprep.subr.bf16.mxu1 %v2933_v1 }
 0x162   :  { %2352 = vmatpush3.bf16.msra.mxu1 %v2475_v61  ;;  %v2215_v61 = vunpack.c.l.bf16 %v3227_v56 }
 0x1e3   :  { %v658_v62 = vpop.f32.mrf.mxu0 }
 0x1e4   :  { %v659_v17 = vadd.f32 %v658_v62, %v484_v13 }
 0x1e5   :  { %v660_v63 = vpop.f32.mrf.mxu0  ;;  %v699_v4 = vpop.f32.mrf.mxu1 }
 0x1e6   :  { %v661_v27 = vadd.f32 %v660_v63, %v488_v21  ;;  %v700_v43 = vadd.f32 %v699_v4, %v492_v39 }
 0x1e7   :  { %v662_v2 = vpop.f32.mrf.mxu0  ;;  %v2295_v5 = vpop.f32.mrf.mxu1 }
 0x1e9   :  { %v663_v3 = vpop.f32.mrf.mxu0  ;;  %v702_v6 = vpop.f32.mrf.mxu1 }
 0x1ea   :  { %v2216_v6 = vunpack.c.h.bf16 %v3227_v56 }
 0x1eb   :  { %v2296_v7 = vpop.f32.mrf.mxu1 }
 0x203   :  { %v918_v16 = vpop.f32.mrf.mxu0 }
 0x204   :  { %v919_v18 = vadd.f32 %v918_v16, %v744_v14 }
 0x205   :  { %v920_v20 = vpop.f32.mrf.mxu0  ;;  %v959_v29 = vpop.f32.mrf.mxu1 }
 0x206   :  { %v965_v22 = vadd.f32 %v919_v18, %v659_v17  ;;  %v921_v25 = vadd.f32 %v920_v20, %v748_v19  ;;  %v960_v41 = vadd.f32 %v959_v29, %v752_v37  ;;  %v3239_v17 = vld [vmem:[#allocation10 + $0x10] sm:$0xff]   ;;  %v2220_v19 = vunpack.c.h.bf16 %v3229_v60 }
 0x207   :  { %v922_v23 = vpop.f32.mrf.mxu0  ;;  %v2315_v30 = vpop.f32.mrf.mxu1 }
 0x208   :  { %v2169_v24 = vmul.f32 -1.442695, %v965_v22  ;;  %v972_v28 = vadd.f32 %v921_v25, %v661_v27  ;;  %v2223_v23 = vunpack.c.l.bf16 %v3239_v17 }
 0x209   :  { %v923_v26 = vpop.f32.mrf.mxu0  ;;  %v962_v32 = vpop.f32.mrf.mxu1 }
 0x20a   :  { %2492 = vpow2.f32 %v2169_v24  ;;  %v2170_v31 = vmul.f32 -1.442695, %v972_v28  ;;  %v3249_v26 = vld [vmem:[#allocation10 + $0x18] sm:$0xff]   ;;  %v2224_v28 = vunpack.c.h.bf16 %v3239_v17 }
 0x20b   :  { %v2316_v33 = vpop.f32.mrf.mxu1  ;;  %v2227_v32 = vunpack.c.l.bf16 %v3249_v26 }
 0x20c   :  { %2494 = vpow2.f32 %v2170_v31 }
 0x217   :  { %v2493_v34 = vpop.eup %2492 }
 0x218   :  { %v969_v35 = vadd.f32 1.0, %v2493_v34 }
 0x219   :  { %v2495_v38 = vpop.eup %2494 }
 0x21a   :  { %2496 = vrcp.f32 %v969_v35  ;;  %v976_v40 = vadd.f32 1.0, %v2495_v38  ;;  %v2228_v35 = vunpack.c.h.bf16 %v3249_v26 }
 0x21c   :  { %2498 = vrcp.f32 %v976_v40  ;;  %v1125_v40 = vand.u32 127, %v481_v8 }
 0x227   :  { %v2497_v42 = vpop.eup %2496 }
 0x228   :  { %v979_v44 = vmul.f32 %v2497_v42, %v960_v41  ;;  %v3269_v42 = vsub.s32 %v1125_v40, %v3202_v9 }
 0x229   :  { %v2499_v48 = vpop.eup %2498 }
 0x22a   :  { %v980_v45 = vadd.f32 %v979_v44, %v700_v43  ;;  %v982_v50 = vsub.f32 1.0, %v2499_v48  ;;  %v984_v53 = vmul.f32 %v2499_v48, %v3041_v0  ;;  %v2219_v0 = vunpack.c.l.bf16 %v3229_v60 }
 0x22c   :  { %2500 = vtanh.f32 %v980_v45 }
 0x239   :  { %v2501_v51 = vpop.eup %2500 }
 0x23a   :  { %v983_v52 = vmul.f32 %v2501_v51, %v982_v50 }
 0x23c   :  { %v985_v55 = vadd.f32 %v984_v53, %v983_v52 }
 0x23e   :  { %v1470_v57 = vpack.c.bf16 %v985_v55, %v985_v55  ;;  %1842 = vst [vmem:[#allocation19] sm:$0xff] %v985_v55  ;;  %v1010_v58 = vrot.slane %v985_v55, %v1009_v54  ;;  %v1003_v59 = vcombine.high %v985_v55, %v985_v55 }
 0x240   :  { %2354 = vmatmul.mubr.bf16.vlgmr.msra.gmra.mxu1 %v1470_v57  ;;  %v1026_v62 = vrot.slane %v1010_v58, %v1009_v54  ;;  %v1018_v63 = vcombine.high %v1010_v58, %v1010_v58  ;;  %v1017_v2 = vrot.slane %v1003_v59, %v1009_v54 }
 0x242   :  { %v1055_v3 = vrot.slane %v1026_v62, %v3205_v10  ;;  %v1048_v4 = vcombine.high %v1026_v62, %v1026_v62  ;;  %v1040_v5 = vrot.slane %v1018_v63, %v1009_v54  ;;  %v1033_v7 = vrot.slane %v1017_v2, %v1009_v54 }
 0x243   :  { %v1019_v11 = vcombine.high %v1017_v2, %v1017_v2 }
 0x244   :  { %v1092_v12 = vmul.f32 %v2215_v61, %v1055_v3  ;;  %v1063_v13 = vrot.slane %v1048_v4, %v3205_v10  ;;  %v1059_v14 = vrot.slane %v1040_v5, %v3205_v10  ;;  %v1050_v16 = vcombine.high %v1040_v5, %v1040_v5 }
 0x245   :  { %v1047_v21 = vrot.slane %v1019_v11, %v1009_v54  ;;  %v1071_v24 = vrot.slane %v1033_v7, %v3205_v10  ;;  %v1049_v25 = vcombine.high %v1033_v7, %v1033_v7 }
 0x246   :  { %1100 = vadd.xlane.f32.xlu0 %v1092_v12  ;;  %v1094_v18 = vmul.f32 %v2219_v0, %v1063_v13  ;;  %v1067_v20 = vrot.slane %v1050_v16, %v3205_v10  ;;  %v1093_v22 = vmul.f32 %v2216_v6, %v1059_v14  ;;  %v1192_v14 = vsub.s32 3, %v3202_v9 }
 0x247   :  { %v1075_v29 = vrot.slane %v1047_v21, %v3205_v10  ;;  %v1051_v30 = vcombine.high %v1047_v21, %v1047_v21  ;;  %v1096_v31 = vmul.f32 %v2223_v23, %v1071_v24  ;;  %v1079_v33 = vrot.slane %v1049_v25, %v3205_v10 }
 0x248   :  { %1104 = vadd.xlane.f32.xlu1 %v1094_v18  ;;  %v1095_v27 = vmul.f32 %v2220_v19, %v1067_v20 }
 0x249   :  { %v1097_v34 = vmul.f32 %v2224_v28, %v1075_v29  ;;  %v1083_v37 = vrot.slane %v1051_v30, %v3205_v10  ;;  %v1098_v38 = vmul.f32 %v2227_v32, %v1079_v33  ;;  %v1200_v33 = vsub.s32 5, %v3202_v9 }
 0x24a   :  { %1102 = vadd.xlane.f32.xlu0 %v1093_v22  ;;  %v1196_v22 = vsub.s32 4, %v3202_v9 }
 0x24b   :  { %v1099_v39 = vmul.f32 %v2228_v35, %v1083_v37 }
 0x24c   :  { %1106 = vadd.xlane.f32.xlu1 %v1095_v27 }
 0x24e   :  { %1108 = vadd.xlane.f32.xlu0 %v1096_v31 }
 0x250   :  { %1110 = vadd.xlane.f32.xlu1 %v1097_v34 }
 0x252   :  { %1112 = vadd.xlane.f32.xlu0 %v1098_v38 }
 0x254   :  { %1114 = vadd.xlane.f32.xlu1 %v1099_v39  ;;  %v1204_v39 = vsub.s32 6, %v3202_v9 }
 0x2cf   :  { %v1101_v41 = vpop.xlane.xlu0 %1100 }
 0x2d0   :  { %v1129_v45 = vrot.slane %v1101_v41, %v3269_v42 }
 0x2d1   :  { %v1105_v43 = vpop.xlane.xlu1 %1104 }
 0x2d2   :  { %v1137_v47 = vrot.slane %v1105_v43, %v3269_v42 }
 0x2d3   :  { %v1103_v44 = vpop.xlane.xlu0 %1102 }
 0x2d4   :  { %v1133_v46 = vrot.slane %v1103_v44, %v3269_v42 }
 0x2d5   :  { %v1107_v48 = vpop.xlane.xlu1 %1106 }
 0x2d6   :  { %v1159_v49 = vsel %vm1158_vm1, %v1133_v46, %v1129_v45  ;;  %v1141_v8 = vrot.slane %v1107_v48, %v3269_v42 }
 0x2d7   :  { %v1161_v50 = vsel %vm1160_vm2, %v1137_v47, %v1159_v49  ;;  %v1109_v51 = vpop.xlane.xlu0 %1108 }
 0x2d8   :  { %v1163_v52 = vsel %vm1162_vm3, %v1141_v8, %v1161_v50  ;;  %v1145_v53 = vrot.slane %v1109_v51, %v3269_v42 }
 0x2d9   :  { %v1111_v54 = vpop.xlane.xlu1 %1110 }
 0x2da   :  { %v1165_v55 = vsel %vm1164_vm4, %v1145_v53, %v1163_v52  ;;  %v1149_v57 = vrot.slane %v1111_v54, %v3269_v42 }
 0x2db   :  { %v1113_v58 = vpop.xlane.xlu0 %1112 }
 0x2dc   :  { %v1153_v59 = vrot.slane %v1113_v58, %v3269_v42  ;;  %v1167_v62 = vsel %vm1166_vm5, %v1149_v57, %v1165_v55 }
 0x2dd   :  { %v1115_v63 = vpop.xlane.xlu1 %1114 }
 0x2de   :  { %v1157_v2 = vrot.slane %v1115_v63, %v3269_v42  ;;  %v1169_v3 = vsel %vm1168_vm6, %v1153_v59, %v1167_v62 }
 0x2e0   :  { %v1171_v4 = vsel %vm1170_vm7, %v1157_v2, %v1169_v3 }
 0x2e1   :  { %v1174_v5 = vsel %vm1173_vm8, %v1171_v4, -inf }
 0x2e2   :  { %1175 = vmax.xlane.f32.xlu0 %v1174_v5 }
 0x300   :  { %v3287_v7 = vpop.f32.mrf.mxu1 }
 0x302   :  { %v2355_v11 = vpop.f32.mrf.mxu1 }
 0x304   :  { %v1709_v12 = vpop.f32.mrf.mxu1 }
 0x306   :  { %v2356_v13 = vpop.f32.mrf.mxu1 }
 0x36b   :  { %v1176_v16 = vpop.xlane.xlu0 %1175 }
 0x36c   :  { %v1181_v18 = vrot.slane %v1176_v16, %v3205_v10  ;;  %v1185_v20 = vrot.slane %v1176_v16, %v3216_v15  ;;  %v1189_v21 = vrot.slane %v1176_v16, %v3221_v36  ;;  %v1193_v24 = vrot.slane %v1176_v16, %v1192_v14 }
 0x36d   :  { %v1197_v34 = vrot.slane %v1176_v16, %v1196_v22  ;;  %v1201_v40 = vrot.slane %v1176_v16, %v1200_v33 }
 0x36e   :  { %v1218_v25 = vsub.f32 %v1101_v41, %v1181_v18  ;;  %v1219_v27 = vsub.f32 %v1103_v44, %v1185_v20  ;;  %v1220_v29 = vsub.f32 %v1105_v43, %v1189_v21  ;;  %v1221_v37 = vsub.f32 %v1107_v48, %v1193_v24 }
 0x36f   :  { %v1222_v45 = vsub.f32 %v1109_v51, %v1197_v34  ;;  %v1208_v43 = vsub.s32 7, %v3202_v9  ;;  %v1205_v44 = vrot.slane %v1176_v16, %v1204_v39  ;;  %v1223_v46 = vsub.f32 %v1111_v54, %v1201_v40 }
 0x370   :  { %v1226_v30 = vmul.f32 1.442695, %v1218_v25  ;;  %v1228_v31 = vmul.f32 1.442695, %v1219_v27  ;;  %v1230_v38 = vmul.f32 1.442695, %v1220_v29 }
 0x371   :  { %v1232_v41 = vmul.f32 1.442695, %v1221_v37  ;;  %v1234_v47 = vmul.f32 1.442695, %v1222_v45  ;;  %v1209_v48 = vrot.slane %v1176_v16, %v1208_v43  ;;  %v1224_v49 = vsub.f32 %v1113_v58, %v1205_v44 }
 0x372   :  { %2502 = vpow2.f32 %v1226_v30  ;;  %v1236_v8 = vmul.f32 1.442695, %v1223_v46 }
 0x373   :  { %2504 = vpow2.f32 %v1228_v31  ;;  %v1225_v51 = vsub.f32 %v1115_v63, %v1209_v48  ;;  %v1238_v53 = vmul.f32 1.442695, %v1224_v49 }
 0x374   :  { %2506 = vpow2.f32 %v1230_v38 }
 0x375   :  { %2508 = vpow2.f32 %v1232_v41  ;;  %v1240_v57 = vmul.f32 1.442695, %v1225_v51 }
 0x376   :  { %2510 = vpow2.f32 %v1234_v47 }
 0x377   :  { %2512 = vpow2.f32 %v1236_v8 }
 0x378   :  { %2514 = vpow2.f32 %v1238_v53 }
 0x379   :  { %2516 = vpow2.f32 %v1240_v57 }
 0x37f   :  { %v2503_v50 = vpop.eup %2502 }
 0x380   :  { %v2505_v52 = vpop.eup %2504  ;;  %1251 = vperm.xlu1 %2402, %v2503_v50  }
 0x381   :  { %1254 = vperm.xlu0 %2403, %v2505_v52   ;;  %v2507_v55 = vpop.eup %2506 }
 0x382   :  { %v2509_v54 = vpop.eup %2508 }
 0x383   :  { %v3307_v59 = vpop.eup %2510 }
 0x384   :  { %1257 = vperm.xlu1 %2402, %v2507_v55   ;;  %v3310_v58 = vpop.eup %2512 }
 0x385   :  { %v3313_v62 = vpop.eup %2514 }
 0x386   :  { %v3316_v63 = vpop.eup %2516 }
 0x388   :  { %1260 = vperm.xlu1 %2402, %v2509_v54  }
 0x38c   :  { %1263 = vperm.xlu1 %2402, %v3307_v59  }
 0x390   :  { %1266 = vperm.xlu1 %2402, %v3310_v58  }
 0x394   :  { %1269 = vperm.xlu1 %2402, %v3313_v62  }
 0x398   :  { %1272 = vperm.xlu1 %2402, %v3316_v63  }
 0x3fb   :  { %v1252_v2 = vpop.permute.xlu1 %1251 }
 0x3fc   :  { %v1255_v11 = vpop.permute.xlu0 %1254  ;;  %v1277_v16 = vrot.slane %v1252_v2, %v3269_v42 }
 0x3fd   :  { %v1281_v13 = vrot.slane %v1255_v11, %v3269_v42  ;;  %v2476_v11 = vld [vmem:[#allocation15 + $0x78] sm:$0xff]  }
 0x3fe   :  { %2318 = vmatpush3.bf16.msra.mxu0 %v2476_v11 }
 0x3ff   :  { %v1258_v3 = vpop.permute.xlu1 %1257  ;;  %v1306_v25 = vsel %vm1158_vm1, %v1281_v13, %v1277_v16  ;;  %2319 = vmatprep.subr.bf16.mxu0 %v2933_v1  ;;  %v2482_v13 = vld [vmem:[#allocation15 + $0x48] sm:$0xff]  }
 0x400   :  { %v1285_v18 = vrot.slane %v1258_v3, %v3269_v42 }
 0x402   :  { %v1307_v29 = vsel %vm1160_vm2, %v1285_v18, %v1306_v25 }
 0x403   :  { %v1261_v4 = vpop.permute.xlu1 %1260 }
 0x404   :  { %v1289_v20 = vrot.slane %v1261_v4, %v3269_v42 }
 0x406   :  { %v1308_v31 = vsel %vm1162_vm3, %v1289_v20, %v1307_v29 }
 0x407   :  { %v1264_v5 = vpop.permute.xlu1 %1263 }
 0x408   :  { %v1293_v21 = vrot.slane %v1264_v5, %v3269_v42 }
 0x40a   :  { %v1309_v34 = vsel %vm1164_vm4, %v1293_v21, %v1308_v31 }
 0x40b   :  { %v1267_v12 = vpop.permute.xlu1 %1266 }
 0x40c   :  { %v1297_v27 = vrot.slane %v1267_v12, %v3269_v42  ;;  %v2481_v12 = vld [vmem:[#allocation15 + $0x50] sm:$0xff]  }
 0x40e   :  { %v1310_v38 = vsel %vm1166_vm5, %v1297_v27, %v1309_v34 }
 0x40f   :  { %v1270_v24 = vpop.permute.xlu1 %1269 }
 0x410   :  { %v1301_v30 = vrot.slane %v1270_v24, %v3269_v42 }
 0x412   :  { %v1311_v45 = vsel %vm1168_vm6, %v1301_v30, %v1310_v38 }
 0x413   :  { %v1273_v37 = vpop.permute.xlu1 %1272 }
 0x414   :  { %v1305_v40 = vrot.slane %v1273_v37, %v3269_v42 }
 0x416   :  { %v1312_v41 = vsel %vm1170_vm7, %v1305_v40, %v1311_v45 }
 0x417   :  { %v1314_v44 = vsel %vm1173_vm8, %v1312_v41, 0.0 }
 0x418   :  { %1315 = vadd.xlane.f32.xlu1 %v1314_v44 }
 0x4a1   :  { %v1316_v46 = vpop.xlane.xlu1 %1315 }
 0x4a2   :  { %v1321_v47 = vrot.slane %v1316_v46, %v3205_v10  ;;  %v1325_v48 = vrot.slane %v1316_v46, %v3216_v15  ;;  %v1329_v49 = vrot.slane %v1316_v46, %v3221_v36  ;;  %v1333_v42 = vrot.slane %v1316_v46, %v1192_v14 }
 0x4a3   :  { %v1337_v8 = vrot.slane %v1316_v46, %v1196_v22  ;;  %v1341_v10 = vrot.slane %v1316_v46, %v1200_v33  ;;  %v1345_v36 = vrot.slane %v1316_v46, %v1204_v39  ;;  %v1349_v22 = vrot.slane %v1316_v46, %v1208_v43  ;;  %v2477_v43 = vld [vmem:[#allocation15 + $0x70] sm:$0xff]  }
 0x4a4   :  { %2518 = vrcp.f32 %v1321_v47  ;;  %2320 = vmatpush3.bf16.msra.mxu0 %v2477_v43 }
 0x4a5   :  { %2520 = vrcp.f32 %v1325_v48  ;;  %2321 = vmatprep.subr.bf16.mxu0 %v2933_v1 }
 0x4a6   :  { %2522 = vrcp.f32 %v1329_v49 }
 0x4a7   :  { %2524 = vrcp.f32 %v1333_v42 }
 0x4a8   :  { %2526 = vrcp.f32 %v1337_v8 }
 0x4a9   :  { %2528 = vrcp.f32 %v1341_v10 }
 0x4aa   :  { %2530 = vrcp.f32 %v1345_v36 }
 0x4ab   :  { %2532 = vrcp.f32 %v1349_v22 }
 0x4b1   :  { %v2519_v51 = vpop.eup %2518 }
 0x4b2   :  { %v1359_v53 = vmul.f32 %v2519_v51, %v2503_v50  ;;  %v2521_v57 = vpop.eup %2520 }
 0x4b3   :  { %v1361_v15 = vmul.f32 %v2521_v57, %v2505_v52  ;;  %v2523_v2 = vpop.eup %2522 }
 0x4b4   :  { %1376 = vperm.xlu0 %2403, %v1359_v53   ;;  %v1363_v14 = vmul.f32 %v2523_v2, %v2507_v55  ;;  %v2525_v3 = vpop.eup %2524 }
 0x4b5   :  { %v1365_v50 = vmul.f32 %v2525_v3, %v2509_v54  ;;  %v2527_v4 = vpop.eup %2526 }
 0x4b6   :  { %v1367_v33 = vmul.f32 %v2527_v4, %v3307_v59  ;;  %v2529_v52 = vpop.eup %2528  ;;  %v2478_v59 = vld [vmem:[#allocation15 + $0x68] sm:$0xff]  }
 0x4b7   :  { %v1369_v5 = vmul.f32 %v2529_v52, %v3310_v58  ;;  %v2531_v39 = vpop.eup %2530  ;;  %2322 = vmatpush3.bf16.msra.mxu0 %v2478_v59  ;;  %v2479_v58 = vld [vmem:[#allocation15 + $0x60] sm:$0xff]  }
 0x4b8   :  { %1381 = vperm.xlu0 %2403, %v1361_v15   ;;  %v1371_v55 = vmul.f32 %v2531_v39, %v3313_v62  ;;  %v2533_v9 = vpop.eup %2532  ;;  %2323 = vmatprep.subr.bf16.mxu0 %v2933_v1  ;;  %v2480_v62 = vld [vmem:[#allocation15 + $0x58] sm:$0xff]  }
 0x4b9   :  { %v1373_v54 = vmul.f32 %v2533_v9, %v3316_v63  ;;  %v2483_v63 = vld [vmem:[#allocation15 + $0x40] sm:$0xff]  }
 0x4bb   :  { %2324 = vmatpush3.bf16.msra.mxu0 %v2479_v58 }
 0x4bc   :  { %1386 = vperm.xlu0 %2403, %v1363_v14   ;;  %2325 = vmatprep.subr.bf16.mxu0 %v2933_v1 }
 0x4bf   :  { %2326 = vmatpush3.bf16.msra.mxu0 %v2480_v62 }
 0x4c0   :  { %1391 = vperm.xlu0 %2403, %v1365_v50   ;;  %2327 = vmatprep.subr.bf16.mxu0 %v2933_v1 }
 0x4c3   :  { %2328 = vmatpush3.bf16.msra.mxu0 %v2481_v12 }
 0x4c4   :  { %1396 = vperm.xlu0 %2403, %v1367_v33   ;;  %2329 = vmatprep.subr.bf16.mxu0 %v2933_v1 }
 0x4c7   :  { %2330 = vmatpush3.bf16.msra.mxu0 %v2482_v13 }
 0x4c8   :  { %1401 = vperm.xlu0 %2403, %v1369_v5   ;;  %2331 = vmatprep.subr.bf16.mxu0 %v2933_v1 }
 0x4cb   :  { %2332 = vmatpush3.bf16.msra.mxu0 %v2483_v63 }
 0x4cc   :  { %1406 = vperm.xlu0 %2403, %v1371_v55   ;;  %2357 = vmatprep.subr.bf16.mxu0 %v2933_v1 }
 0x4d0   :  { %1411 = vperm.xlu0 %2403, %v1373_v54  }
 0x52f   :  { %v1377_v16 = vpop.permute.xlu0 %1376 }
 0x530   :  { %v1414_v21 = vmul.f32 %v2215_v61, %v1377_v16 }
 0x532   :  { %v1422_v29 = vrot.slane %v1414_v21, 4 }
 0x533   :  { %v1382_v18 = vpop.permute.xlu0 %1381 }
 0x534   :  { %v1415_v20 = vmul.f32 %v2216_v6, %v1382_v18  ;;  %v1423_v38 = vadd.f32 %v1422_v29, %v1414_v21 }
 0x536   :  { %v1428_v25 = vrot.slane %v1415_v20, 4  ;;  %v1424_v56 = vrot.slane %v1423_v38, 2 }
 0x537   :  { %v1387_v24 = vpop.permute.xlu0 %1386 }
 0x538   :  { %v1416_v27 = vmul.f32 %v2219_v0, %v1387_v24  ;;  %v1429_v34 = vadd.f32 %v1428_v25, %v1415_v20  ;;  %v1425_v60 = vadd.f32 %v1424_v56, %v1423_v38 }
 0x53a   :  { %v1434_v30 = vrot.slane %v1416_v27, 4  ;;  %v1430_v6 = vrot.slane %v1429_v34, 2 }
 0x53b   :  { %v1392_v31 = vpop.permute.xlu0 %1391 }
 0x53c   :  { %v1417_v37 = vmul.f32 %v2220_v19, %v1392_v31  ;;  %v1435_v40 = vadd.f32 %v1434_v30, %v1416_v27  ;;  %v1431_v49 = vadd.f32 %v1430_v6, %v1429_v34 }
 0x53e   :  { %v1440_v45 = vrot.slane %v1417_v37, 4  ;;  %v1436_v61 = vrot.slane %v1435_v40, 2  ;;  %v1432_v15 = vrot.slane %v1431_v49, 1 }
 0x53f   :  { %v1397_v41 = vpop.permute.xlu0 %1396 }
 0x540   :  { %v1441_v44 = vadd.f32 %v1440_v45, %v1417_v37  ;;  %v1418_v46 = vmul.f32 %v2223_v23, %v1397_v41  ;;  %v1437_v19 = vadd.f32 %v1436_v61, %v1435_v40  ;;  %v1426_v23 = vrot.slane %v1425_v60, 1 }
 0x541   :  { %v1433_v33 = vadd.f32 %v1432_v15, %v1431_v49  ;;  %v2491_v15 = vld [vmem:[#allocation16] sm:$0xff]  }
 0x542   :  { %v1442_v47 = vrot.slane %v1441_v44, 2  ;;  %v1446_v0 = vrot.slane %v1418_v46, 4  ;;  %v1438_v14 = vrot.slane %v1437_v19, 1  ;;  %v1427_v11 = vadd.f32 %v1426_v23, %v1425_v60 }
 0x543   :  { %v1402_v48 = vpop.permute.xlu0 %1401  ;;  %v1488_v58 = vpack.c.bf16 %v1433_v33, %v1433_v33 }
 0x544   :  { %v1419_v42 = vmul.f32 %v2224_v28, %v1402_v48  ;;  %v1447_v8 = vadd.f32 %v1446_v0, %v1418_v46  ;;  %v1443_v51 = vadd.f32 %v1442_v47, %v1441_v44  ;;  %v1439_v55 = vadd.f32 %v1438_v14, %v1437_v19  ;;  %v2485_v19 = vld [vmem:[#allocation16 + $0x30] sm:$0xff]  }
 0x545   :  { %v1487_v16 = vpack.c.bf16 %v1427_v11, %v1427_v11  ;;  %v1520_v25 = vunpack.c.l.b16 %v1488_v58 }
 0x546   :  { %v1452_v53 = vrot.slane %v1419_v42, 4  ;;  %v1448_v10 = vrot.slane %v1447_v8, 2  ;;  %v1444_v3 = vrot.slane %v1443_v51, 1  ;;  %v1489_v63 = vpack.c.bf16 %v1439_v55, %v1439_v55 }
 0x547   :  { %v1407_v57 = vpop.permute.xlu0 %1406  ;;  %v1519_v30 = vunpack.c.l.b16 %v1487_v16 }
 0x548   :  { %v1453_v36 = vadd.f32 %v1452_v53, %v1419_v42  ;;  %v1420_v2 = vmul.f32 %v2227_v32, %v1407_v57  ;;  %v1449_v22 = vadd.f32 %v1448_v10, %v1447_v8  ;;  %v1445_v9 = vadd.f32 %v1444_v3, %v1443_v51  ;;  %v2484_v42 = vld [vmem:[#allocation16 + $0x38] sm:$0xff]   ;;  %v2486_v8 = vld [vmem:[#allocation16 + $0x28] sm:$0xff]   ;;  %v2487_v51 = vld [vmem:[#allocation16 + $0x20] sm:$0xff]  }
 0x549   :  { %v1521_v29 = vunpack.c.l.b16 %v1489_v63  ;;  %v1527_v40 = vsel %vm1158_vm1, %v1520_v25, %v1519_v30  ;;  %v2488_v53 = vld [vmem:[#allocation16 + $0x18] sm:$0xff]   ;;  %v2489_v10 = vld [vmem:[#allocation16 + $0x10] sm:$0xff]   ;;  %v2490_v57 = vld [vmem:[#allocation16 + $0x8] sm:$0xff]  }
 0x54a   :  { %v1454_v50 = vrot.slane %v1453_v36, 2  ;;  %v1458_v4 = vrot.slane %v1420_v2, 4  ;;  %v1450_v17 = vrot.slane %v1449_v22, 1  ;;  %v1490_v18 = vpack.c.bf16 %v1445_v9, %v1445_v9 }
 0x54b   :  { %v1412_v28 = vpop.permute.xlu0 %1411  ;;  %v1528_v6 = vsel %vm1160_vm2, %v1521_v29, %v1527_v40 }
 0x54c   :  { %v1455_v52 = vadd.f32 %v1454_v50, %v1453_v36  ;;  %v1459_v5 = vadd.f32 %v1458_v4, %v1420_v2  ;;  %v1421_v39 = vmul.f32 %v2228_v35, %v1412_v28  ;;  %v1451_v59 = vadd.f32 %v1450_v17, %v1449_v22  ;;  %v2187_v2 = vld [vmem:[%s3412_s7 + $0x2] ss:$0 sm:$0xff]  ;;  %s2937_s7 = smov [#allocation19]  }
 0x54d   :  { %v1522_v31 = vunpack.c.l.b16 %v1490_v18  ;;  %s1859_s15 = sshll.u32 %s2937_s7, 4  ;;  %s1860_s15 = int_to_ptr.vmem [resolvable:$true] %s1859_s15 }
 0x54e   :  { %v1456_v43 = vrot.slane %v1455_v52, 1  ;;  %v1460_v54 = vrot.slane %v1459_v5, 2  ;;  %v1464_v32 = vrot.slane %v1421_v39, 4  ;;  %v1491_v24 = vpack.c.bf16 %v1451_v59, %v1451_v59  ;;  %s2844_s14 = scalar_lea.vmem %s1860_s15, 128  ;;  %p2849_p13 = scmp.lt.s32.totalorder %s1860_s15, %s1860_s15 }
 0x54f   :  { %v1529_v56 = vsel %vm1162_vm3, %v1522_v31, %v1528_v6  ;;  %p2845_p12 = scmp.ne.s32.totalorder %s1860_s15, %s2844_s14  ;;  %p2850_p0 = scmp.lt.s32.totalorder %s2844_s14, %s2844_s14 }
 0x550   :  { %v1457_v62 = vadd.f32 %v1456_v43, %v1455_v52  ;;  %v1461_v12 = vadd.f32 %v1460_v54, %v1459_v5  ;;  %v1465_v13 = vadd.f32 %v1464_v32, %v1421_v39  ;;  %v1523_v38 = vunpack.c.l.b16 %v1491_v24 }
 0x551   :  { %p2851_p1 = por %p2850_p0, %p2849_p13 }
 0x552   :  { %v1462_v20 = vrot.slane %v1461_v12, 1  ;;  %v1466_v21 = vrot.slane %v1465_v13, 2  ;;  %v1492_v26 = vpack.c.bf16 %v1457_v62, %v1457_v62  ;;  %v1530_v46 = vsel %vm1164_vm4, %v1523_v38, %v1529_v56 }
 0x553   :  { %p2852_p2 = pnand %p2851_p1, %p2845_p12 }
 0x554   :  { %v1463_v35 = vadd.f32 %v1462_v20, %v1461_v12  ;;  %v1467_v27 = vadd.f32 %v1466_v21, %v1465_v13  ;;  %v1524_v45 = vunpack.c.l.b16 %v1492_v26 }
 0x556   :  { %v1493_v34 = vpack.c.bf16 %v1463_v35, %v1463_v35  ;;  %v1468_v37 = vrot.slane %v1467_v27, 1  ;;  %v1531_v47 = vsel %vm1166_vm5, %v1524_v45, %v1530_v46 }
 0x558   :  { %v1469_v41 = vadd.f32 %v1468_v37, %v1467_v27  ;;  %v1525_v44 = vunpack.c.l.b16 %v1493_v34 }
 0x55a   :  { %v1494_v61 = vpack.c.bf16 %v1469_v41, %v1469_v41  ;;  %v1532_v48 = vsel %vm1168_vm6, %v1525_v44, %v1531_v47 }
 0x55c   :  { %v1526_v0 = vunpack.c.l.b16 %v1494_v61 }
 0x55e   :  { %v1533_v49 = vsel %vm1170_vm7, %v1526_v0, %v1532_v48 }
 0x55f   :  { %v1534_v60 = vpack.c.b16 %v1533_v49, %v1533_v49 }
 0x561   :  { %2334 = vmatmul.mubr.bf16.vlgmr.msra.gmra.mxu0 %v1534_v60 }
 0x562   :  { %2358 = vmatpush3.bf16.msra.mxu0 %v2484_v42  ;;  %2373 = vmatprep.mubr.msk.bf16.mxu0 %vm2935_vm0, %v2933_v1 }
 0x563   :  { %2359 = vmatprep.subr.bf16.mxu0 %v2933_v1 }
 0x566   :  { %2360 = vmatpush3.bf16.msra.mxu0 %v2485_v19 }
 0x567   :  { %2361 = vmatprep.subr.bf16.mxu0 %v2933_v1 }
 0x56a   :  { %2362 = vmatpush3.bf16.msra.mxu0 %v2486_v8 }
 0x56b   :  { %2363 = vmatprep.subr.bf16.mxu0 %v2933_v1 }
 0x56e   :  { %2364 = vmatpush3.bf16.msra.mxu0 %v2487_v51 }
 0x56f   :  { %2365 = vmatprep.subr.bf16.mxu0 %v2933_v1 }
 0x572   :  { %2366 = vmatpush3.bf16.msra.mxu0 %v2488_v53 }
 0x573   :  { %2367 = vmatprep.subr.bf16.mxu0 %v2933_v1 }
 0x576   :  { %2368 = vmatpush3.bf16.msra.mxu0 %v2489_v10 }
 0x577   :  { %2369 = vmatprep.subr.bf16.mxu0 %v2933_v1 }
 0x57a   :  { %2370 = vmatpush3.bf16.msra.mxu0 %v2490_v57 }
 0x57b   :  { %2371 = vmatprep.subr.bf16.mxu0 %v2933_v1  ;;  %v2188_v1 = vld [vmem:[%s3413_s8] ss:$0 sm:$0xff] }
 0x57e   :  { %2372 = vmatpush3.bf16.msra.mxu0 %v2491_v15 }
 0x621   :  { %v1618_v36 = vpop.f32.mrf.mxu0 }
 0x622   :  { %v1707_v23 = vadd.f32 %v3287_v7, %v1618_v36 }
 0x623   :  { %v2335_v14 = vpop.f32.mrf.mxu0 }
 0x624   :  { %v1717_v22 = vadd.f32 %v2187_v2, %v1707_v23 }
 0x625   :  { %v1621_v3 = vpop.f32.mrf.mxu0 }
 0x626   :  { %2534 = vtanh.f32 %v1717_v22 }
 0x627   :  { %v2336_v50 = vpop.f32.mrf.mxu0 }
 0x633   :  { %v2535_v4 = vpop.eup %2534 }
 0x634   :  { %v1719_v17 = vpack.c.bf16 %v2535_v4, %v2535_v4 }
 0x636   :  { %2374 = vmatmul.mubr.bf16.vlgmr.msra.gmra.mxu0 %v1719_v17 }
 0x6f6   :  { %v1825_v28 = vpop.f32.mrf.mxu0 }
 0x6f7   :  { %v1826_v33 = vadd.f32 %v2188_v1, %v1825_v28 }
 0x6f8   :  { %v2375_v52 = vpop.f32.mrf.mxu0 }
 0x6f9   :  { %1831 = vmax.xlane.f32.xlu1 %v1826_v33 }
 0x6fa   :  { %v1828_v5 = vpop.f32.mrf.mxu0 }
 0x6fc   :  { %v2376_v39 = vpop.f32.mrf.mxu0 }
 0x782   :  { %v1832_v11 = vpop.xlane.xlu1 %1831 }
 0x783   :  { %v1833_v7 = vsub.f32 %v1826_v33, %v1832_v11 }
 0x785   :  { %v1834_v55 = vmul.f32 1.442695, %v1833_v7 }
 0x787   :  { %2536 = vpow2.f32 %v1834_v55 }
 0x794   :  { %v2537_v9 = vpop.eup %2536 }
 0x795   :  { %1836 = vadd.xlane.f32.xlu0 %v2537_v9 }
 0x796   :  { %2855 = shalt.err (!%p2852_p2)
}
 0x797   :  { %1862 = dma.vmem_to_hbm [thread:$0]  %s1860_s15, 128, %s3416_s11, [#allocation20]  }
 0x798   :  { %s2938_s18 = smov [#allocation18]  }
 0x799   :  { %s1849_s16 = sshll.u32 %s2938_s18, 4  ;;  %s1850_s16 = int_to_ptr.vmem [resolvable:$true] %s1849_s16 }
 0x79a   :  { %s2864_s22 = scalar_lea.vmem %s1850_s16, 128  ;;  %p2869_p4 = scmp.lt.s32.totalorder %s1850_s16, %s1850_s16 }
 0x79b   :  { %p2865_p3 = scmp.ne.s32.totalorder %s1850_s16, %s2864_s22  ;;  %p2870_p5 = scmp.lt.s32.totalorder %s2864_s22, %s2864_s22 }
 0x79d   :  { %p2871_p6 = por %p2870_p5, %p2869_p4 }
 0x79f   :  { %p2872_p7 = pnand %p2871_p6, %p2865_p3 }
 0x81e   :  { %v1837_v43 = vpop.xlane.xlu0 %1836 }
 0x81f   :  { %2538 = vrcp.f32 %v1837_v43 }
 0x82c   :  { %v2539_v54 = vpop.eup %2538 }
 0x82d   :  { %v1839_v32 = vmul.f32 %v2539_v54, %v2537_v9 }
 0x82f   :  { %1840 = vst [vmem:[#allocation18] sm:$0xff] %v1839_v32 }
 0x830   :  { %2875 = shalt.err (!%p2872_p7)
}
 0x831   :  { %1852 = dma.vmem_to_hbm [thread:$0]  %s1850_s16, 128, %s3415_s10, [#allocation9]  }
 0x832   :  { %2910 = dma.done.wait [#allocation9], 128  }
 0x833   :  { %2911 = vsyncadd [#allocation9], 4294967168 }
 0x834   :  { %2912 = dma.done.wait [#allocation20], 128  }
 0x835   :  { %2913 = vsyncadd [#allocation20], 4294967168 }
 0x836   :  { %1869 = vsyncpa [#allocation8], 1 }
 0x837   :  { %1870 = vsyncpa [#allocation11], 1 }
 0x838   :  { %1871 = vsyncpa [#allocation14], 1 }
 0x839   :  { %1872 = vsyncpa [#allocation17], 1 }
 0x83a   :  { %1873 = vsyncpa [#allocation9], 1 }
 0x83b   :  { %1874 = vsyncpa [#allocation20], 1 }
 0x83c   :  { %1875 = vsyncmov [#allocation4] }
 0x83f   :  { %s1876_s11 = vpop.sfrf %1875 }
 0x840   :  { %p2197_p8 = scmp.ne.s32.totalorder %s1876_s11, 0 }
 0x842   :  { %1880 = shalt.err (%p2197_p8)  }
 0x843   :  { %1882 = vsyncmov [#allocation4 + $0x1] }
 0x846   :  { %s1883_s24 = vpop.sfrf %1882 }
 0x847   :  { %p2198_p9 = scmp.ne.s32.totalorder %s1883_s24, 0 }
 0x849   :  { %1887 = shalt.err (%p2198_p9)  }
 0x84a   :  { %1889 = vsyncmov [#allocation4 + $0x2] }
 0x84d   :  { %s1890_s10 = vpop.sfrf %1889 }
 0x84e   :  { %p2199_p10 = scmp.ne.s32.totalorder %s1890_s10, 0 }
 0x850   :  { %1894 = shalt.err (%p2199_p10)  }
 0x851   :  { %1896 = vsyncmov [#allocation4 + $0x3] }
 0x854   :  { %s1897_s17 = vpop.sfrf %1896 }
 0x855   :  { %p2200_p11 = scmp.ne.s32.totalorder %s1897_s17, 0 }
 0x857   :  { %1901 = shalt.err (%p2200_p11)  }
 0x858   :  { %1903 = vsyncmov [#allocation4 + $0x4] }
 0x85b   :  { %s1904_s21 = vpop.sfrf %1903 }
 0x85c   :  { %p2201_p12 = scmp.ne.s32.totalorder %s1904_s21, 0 }
 0x85e   :  { %1908 = shalt.err (%p2201_p12)  }
 0x85f   :  { %1910 = vsyncmov [#allocation4 + $0x5] }
 0x862   :  { %s1911_s25 = vpop.sfrf %1910 }
 0x863   :  { %p2202_p13 = scmp.ne.s32.totalorder %s1911_s25, 0 }
 0x865   :  { %1915 = shalt.err (%p2202_p13)  }
 0x866   :  { %1917 = vsyncmov [#allocation4 + $0x6] }
 0x869   :  { %s1918_s2 = vpop.sfrf %1917 }
 0x86a   :  { %p2203_p0 = scmp.ne.s32.totalorder %s1918_s2, 0 }
 0x86c   :  { %1922 = shalt.err (%p2203_p0)  }
 0x86d   :  { %1924 = vsyncmov [#allocation4 + $0x7] }
 0x870   :  { %s1925_s23 = vpop.sfrf %1924 }
 0x871   :  { %p2204_p1 = scmp.ne.s32.totalorder %s1925_s23, 0 }
 0x873   :  { %1929 = shalt.err (%p2204_p1)  }
 0x874   :  { %1931 = vsyncmov [#allocation4 + $0x8] }
 0x877   :  { %s1932_s1 = vpop.sfrf %1931 }
 0x878   :  { %p2205_p2 = scmp.ne.s32.totalorder %s1932_s1, 0 }
 0x87a   :  { %1936 = shalt.err (%p2205_p2)  }
 0x87b   :  { %1938 = vsyncmov [#allocation4 + $0x9] }
 0x87e   :  { %s1939_s27 = vpop.sfrf %1938 }
 0x87f   :  { %p2206_p3 = scmp.ne.s32.totalorder %s1939_s27, 0 }
 0x881   :  { %1943 = shalt.err (%p2206_p3)  }
 0x882   :  { %1945 = vsyncmov [#allocation4 + $0xa] }
 0x885   :  { %s1946_s28 = vpop.sfrf %1945 }
 0x886   :  { %p2207_p4 = scmp.ne.s32.totalorder %s1946_s28, 0 }
 0x888   :  { %1950 = shalt.err (%p2207_p4)  }
 0x889   :  { %1952 = vsyncmov [#allocation4 + $0xb] }
 0x88c   :  { %s1953_s29 = vpop.sfrf %1952 }
 0x88d   :  { %p2208_p5 = scmp.ne.s32.totalorder %s1953_s29, 0 }
 0x88f   :  { %1957 = shalt.err (%p2208_p5)  }
 0x890   :  { %1959 = vsyncmov [#allocation4 + $0xc] }
 0x893   :  { %s1960_s30 = vpop.sfrf %1959 }
 0x894   :  { %p2209_p6 = scmp.ne.s32.totalorder %s1960_s30, 0 }
 0x896   :  { %1964 = shalt.err (%p2209_p6)  }
 0x897   :  { %1966 = vsyncmov [#allocation4 + $0xd] }
 0x89a   :  { %s1967_s9 = vpop.sfrf %1966 }
 0x89b   :  { %p2210_p7 = scmp.ne.s32.totalorder %s1967_s9, 0 }
 0x89d   :  { %1971 = shalt.err (%p2210_p7)  }
 0x89e   :  { %1973 = vsyncmov [#allocation4 + $0xe] }
 0x8a1   :  { %s1974_s13 = vpop.sfrf %1973 }
 0x8a2   :  { %p2211_p8 = scmp.ne.s32.totalorder %s1974_s13, 0 }
 0x8a4   :  { %1978 = shalt.err (%p2211_p8)  }
 0x8a5   :  { %1980 = vsyncmov [#allocation4 + $0xf] }
 0x8a8   :  { %s1981_s26 = vpop.sfrf %1980 }
 0x8a9   :  { %p2212_p9 = scmp.ne.s32.totalorder %s1981_s26, 0 }
 0x8ab   :  { %1985 = shalt.err (%p2212_p9)  }

</bundles_post_ra>
